<compile_context>
chip_gen: v5e
topology: v5e:2x2
jax: 0.10.0
libtpu: 0.0.40
codegen_flags: <defaults>
</compile_context>

<pallas_src>
import functools

import jax
import jax.numpy as jnp
from jax import lax
from jax.experimental import pallas as pl
from jax.experimental.pallas import tpu as pltpu


def _seq_disc_kernel(num_layers, T, H, Gp, coords_ref, cond_ref, tlen_ref, *refs):
    """Whole forward pass in one kernel invocation (no grid).

    refs = [4 weight refs per layer, Wfc, bfc, out_ref, gates_buf, (seq_buf if L>1)]
      coords_ref : [T*Bp, 4]   bf16, time-major, batch-padded, flattened (row t*Bp + b)
      cond_ref   : [Bp, H]     bf16
      tlen_ref   : [Bp, 1]     int32, clamped per-batch timestep index
      gates_buf  : [T*Bp, Gp]  f32, hoisted input projection + bias (gates in cols [0, 4H))
      seq_buf    : [T*Bp, H]   f32, previous-layer output sequence
    """
    n_w = 4 * num_layers
    layer_refs = refs[:n_w]
    wfc_ref = refs[n_w]
    bfc_ref = refs[n_w + 1]
    out_ref = refs[n_w + 2]
    gates_buf = refs[n_w + 3]
    seq_buf = refs[n_w + 4] if num_layers > 1 else None

    Bp = cond_ref.shape[0]
    cond = cond_ref[...]                       # [Bp, H] bf16
    idx = tlen_ref[...]                        # [Bp, 1] int32 (already clamped)

    last = jnp.zeros((Bp, H), jnp.float32)     # running-select "gathered" hidden state
    unroll = True if T <= 32 else 8

    for l in range(num_layers):
        wih_ref, whh_ref, b_ref, wc0_ref = layer_refs[4 * l:4 * l + 4]
        is_first = (l == 0)
        is_last = (l == num_layers - 1)

        # ---- hoisted whole-sequence input projection + bias (one big bf16 MXU matmul) ----
        # Deeper layers read seq_buf fully BEFORE this layer's time loop overwrites it.
        x_seq = coords_ref[...] if is_first else seq_buf[...].astype(jnp.bfloat16)
        gates_buf[...] = (jnp.dot(x_seq, wih_ref[...],
                                  preferred_element_type=jnp.float32)
                          + b_ref[...])                                # [T*Bp, Gp]

        # cond-conditioned initial state: ONE matmul + ONE tanh for (h0 | c0)
        hc0 = jnp.tanh(jnp.dot(cond, wc0_ref[...],
                               preferred_element_type=jnp.float32))    # [Bp, 2H]
        h0 = hc0[:, 0:H]
        c0 = hc0[:, H:2 * H]

        def body(t, carry, whh_ref=whh_ref, is_last=is_last):
            h, c, lst = carry
            row = pl.multiple_of(t * Bp, Bp)
            # Read Whh from VMEM every step (do not hold it live in vregs across the loop).
            gates = (gates_buf[pl.ds(row, Bp), :]
                     + jnp.dot(h.astype(jnp.bfloat16), whh_ref[...],
                               preferred_element_type=jnp.float32))    # [Bp, Gp]
            ifo = jax.nn.sigmoid(gates[:, 0:3 * H])                    # one sigmoid slab
            g_g = jnp.tanh(gates[:, 3 * H:4 * H])                      # one tanh slab
            i_g = ifo[:, 0:H]
            f_g = ifo[:, H:2 * H]
            o_g = ifo[:, 2 * H:3 * H]
            c_new = f_g * c + i_g * g_g
            h_new = o_g * jnp.tanh(c_new)
            if is_last:
                # running select == torch.gather(lstm_output, 1, text_len_)[:, 0, :]
                lst = jnp.where(idx == t, h_new, lst)
            else:
                seq_buf[pl.ds(row, Bp), :] = h_new
            return (h_new, c_new, lst)

        _, _, last = lax.fori_loop(0, T, body, (h0, c0, last), unroll=unroll)

    logits = jnp.dot(last, wfc_ref[...], preferred_element_type=jnp.float32) + bfc_ref[...]
    out_ref[...] = jax.nn.sigmoid(logits)


def _round_up(x, m):
    return ((x + m - 1) // m) * m


def _pack_gates(w, H, Gp):
    """[..., 4H] in torch (i,f,g,o) order -> dense [..., Gp] in (i,f,o,g) order, zero tail."""
    i = w[..., 0 * H:1 * H]
    f = w[..., 1 * H:2 * H]
    g = w[..., 2 * H:3 * H]
    o = w[..., 3 * H:4 * H]
    dense = jnp.concatenate([i, f, o, g], axis=-1)                     # [..., 4H]
    pad = [(0, 0)] * (w.ndim - 1) + [(0, Gp - 4 * H)]
    return jnp.pad(dense, pad)


def seq_discriminator(coords, cond, text_len_, params, *, hidden_size, num_hidden_layers):
    """coords: [B, T, 4] f32; cond: [B, H] f32; text_len_: [B, 1, H] int32 (torch-gather index)."""
    B, T, in_dim = coords.shape
    H = hidden_size
    assert in_dim == 4

    Gp = _round_up(4 * H, 128)   # dense gate packing, lane-padded total width
    Bp = _round_up(B, 8)         # sublane-align batch/state rows

    # time-major, batch-padded, flattened coords: [T*Bp, 4] (row t*Bp + b == (t, b))
    coords_t = jnp.transpose(coords, (1, 0, 2)).astype(jnp.float32)          # [T, B, 4]
    coords_t = jnp.pad(coords_t, ((0, 0), (0, Bp - B), (0, 0)))              # [T, Bp, 4]
    coords_flat = coords_t.reshape(T * Bp, in_dim).astype(jnp.bfloat16)

    cond_p = jnp.pad(cond.astype(jnp.float32),
                     ((0, Bp - B), (0, 0))).astype(jnp.bfloat16)             # [Bp, H]

    # torch-gather timestep index, clamped (no runtime bounds check on VMEM refs otherwise)
    tlen_idx = jnp.clip(text_len_[:, 0, 0].astype(jnp.int32), 0, T - 1)      # [B]
    tlen_p = jnp.pad(tlen_idx, (0, Bp - B)).reshape(Bp, 1)                   # [Bp, 1]

    # repack weights: dense gates in (i,f,o,g) order, bf16 matmul operands, f32 bias
    packed = []
    p = 0
    for _ in range(num_hidden_layers):
        Wih, Whh, b, Wch, Wcc = params[p:p + 5]
        p += 5
        packed += [
            _pack_gates(Wih.astype(jnp.float32), H, Gp).astype(jnp.bfloat16),   # [in_dim_l, Gp]
            _pack_gates(Whh.astype(jnp.float32), H, Gp).astype(jnp.bfloat16),   # [H, Gp]
            _pack_gates(b.astype(jnp.float32), H, Gp),                          # [1, Gp] f32
            jnp.concatenate([Wch, Wcc], axis=1).astype(jnp.bfloat16),           # [H, 2H]
        ]
    Wfc, bfc = params[p], params[p + 1]
    packed += [Wfc.astype(jnp.float32), bfc.astype(jnp.float32)]

    in_arrays = [coords_flat, cond_p, tlen_p] + packed

    scratch_shapes = [pltpu.VMEM((T * Bp, Gp), jnp.float32)]                 # gate pre-activations
    if num_hidden_layers > 1:
        scratch_shapes.append(pltpu.VMEM((T * Bp, H), jnp.float32))          # prev-layer outputs

    # explicit scoped-VMEM budget (inputs + scratch + output, 2x headroom), capped at 64 MiB
    needed = sum(int(a.size) * a.dtype.itemsize for a in in_arrays) + Bp * 4
    needed += (T * Bp) * Gp * 4
    if num_hidden_layers > 1:
        needed += (T * Bp) * H * 4
    vmem_limit = int(min(max(2 * needed, 32 * 1024 * 1024), 64 * 1024 * 1024))

    kernel = functools.partial(_seq_disc_kernel, num_hidden_layers, T, H, Gp)

    out = pl.pallas_call(
        kernel,
        out_shape=jax.ShapeDtypeStruct((Bp, 1), jnp.float32),
        in_specs=[pl.BlockSpec(memory_space=pltpu.MemorySpace.VMEM)] * len(in_arrays),
        out_specs=pl.BlockSpec(memory_space=pltpu.MemorySpace.VMEM),
        scratch_shapes=scratch_shapes,
        compiler_params=pltpu.CompilerParams(vmem_limit_bytes=vmem_limit),
    )(*in_arrays)

    return out[:B]


def init_params(key, hidden_size, num_hidden_layers, in_dim=4):
    params = []
    for l in range(num_hidden_layers):
        d = in_dim if l == 0 else hidden_size
        key, k0, k1, k2, k3, k4 = jax.random.split(key, 6)
        params += [
            0.2 * jax.random.normal(k0, (d, 4 * hidden_size), jnp.float32),            # W_ih
            0.2 * jax.random.normal(k1, (hidden_size, 4 * hidden_size), jnp.float32),  # W_hh
            0.1 * jax.random.normal(k2, (1, 4 * hidden_size), jnp.float32),            # bias
            0.2 * jax.random.normal(k3, (hidden_size, hidden_size), jnp.float32),      # W_cond->h0
            0.2 * jax.random.normal(k4, (hidden_size, hidden_size), jnp.float32),      # W_cond->c0
        ]
    key, k1, k2 = jax.random.split(key, 3)
    params += [
        0.2 * jax.random.normal(k1, (hidden_size, 1), jnp.float32),                    # fc weight
        0.1 * jax.random.normal(k2, (1, 1), jnp.float32),                              # fc bias
    ]
    return params


def reference(coords, cond, idx, params, num_layers, H):
    """Pure-JAX f32 reference of the same math (torch gate order i,f,g,o)."""
    B, T, _ = coords.shape
    x = coords
    p = 0
    for l in range(num_layers):
        Wih, Whh, b, Wch, Wcc = params[p:p + 5]
        p += 5
        h = jnp.tanh(cond @ Wch)
        c = jnp.tanh(cond @ Wcc)
        outs = []
        for t in range(T):
            gates = x[:, t, :] @ Wih + h @ Whh + b
            i_g = jax.nn.sigmoid(gates[:, :H])
            f_g = jax.nn.sigmoid(gates[:, H:2 * H])
            g_g = jnp.tanh(gates[:, 2 * H:3 * H])
            o_g = jax.nn.sigmoid(gates[:, 3 * H:4 * H])
            c = f_g * c + i_g * g_g
            h = o_g * jnp.tanh(c)
            outs.append(h)
        x = jnp.stack(outs, axis=1)
    last = x[jnp.arange(B), idx]
    Wfc, bfc = params[p], params[p + 1]
    return jax.nn.sigmoid(last @ Wfc + bfc)


if __name__ == "__main__":
    B, T, H, L = 2, 8, 32, 2

    key = jax.random.PRNGKey(0)
    kc, kd, kp = jax.random.split(key, 3)

    coords = jax.random.normal(kc, (B, T, 4), jnp.float32)        # [B, T, 4] pen-stroke coords
    cond = jax.random.normal(kd, (B, H), jnp.float32)             # conditioning vector
    lengths = jnp.array([7, 5], dtype=jnp.int32)                  # valid sequence lengths
    # torch-style gather index tensor: [B, 1, H] filled with (len - 1)
    text_len_ = jnp.broadcast_to((lengths - 1)[:, None, None], (B, 1, H)).astype(jnp.int32)

    params = init_params(kp, H, L)

    out = seq_discriminator(coords, cond, text_len_, params,
                            hidden_size=H, num_hidden_layers=L)
    out = jax.block_until_ready(out)

    ref = reference(coords, cond, text_len_[:, 0, 0], params, L, H)

    assert out.shape == (B, 1)
    assert bool(jnp.all(jnp.isfinite(out)))
    assert bool(jnp.allclose(out, ref, atol=5e-2)), (out, ref)

    print("KERNEL_OK")
</pallas_src>

<mosaic_0001>
module attributes {stable_mosaic.version = 11 : i64} {
  func.func @_seq_disc_kernel(%arg0: memref<64x4xbf16, #tpu.memory_space<vmem>>, %arg1: memref<8x32xbf16, #tpu.memory_space<vmem>>, %arg2: memref<8x1xi32, #tpu.memory_space<vmem>>, %arg3: memref<4x128xbf16, #tpu.memory_space<vmem>>, %arg4: memref<32x128xbf16, #tpu.memory_space<vmem>>, %arg5: memref<1x128xf32, #tpu.memory_space<vmem>>, %arg6: memref<32x64xbf16, #tpu.memory_space<vmem>>, %arg7: memref<32x128xbf16, #tpu.memory_space<vmem>>, %arg8: memref<32x128xbf16, #tpu.memory_space<vmem>>, %arg9: memref<1x128xf32, #tpu.memory_space<vmem>>, %arg10: memref<32x64xbf16, #tpu.memory_space<vmem>>, %arg11: memref<32x1xf32, #tpu.memory_space<vmem>>, %arg12: memref<1x1xf32, #tpu.memory_space<vmem>>, %arg13: memref<8x1xf32, #tpu.memory_space<vmem>>, %arg14: memref<64x128xf32, #tpu.memory_space<vmem>>, %arg15: memref<64x32xf32, #tpu.memory_space<vmem>>) attributes {dimension_semantics = [], scalar_prefetch = 0 : i64, scratch_operands = 2 : i64, tpu.core_type = #tpu.core_type<tc>} {
    %c0 = arith.constant 0 : index
    %c0_0 = arith.constant 0 : index
    %0 = vector.load %arg1[%c0, %c0_0] : memref<8x32xbf16, #tpu.memory_space<vmem>>, vector<8x32xbf16>
    %c0_1 = arith.constant 0 : index
    %c0_2 = arith.constant 0 : index
    %1 = vector.load %arg2[%c0_1, %c0_2] : memref<8x1xi32, #tpu.memory_space<vmem>>, vector<8x1xi32>
    %cst = arith.constant 0.000000e+00 : f32
    %2 = vector.broadcast %cst : f32 to vector<8x32xf32>
    %c0_3 = arith.constant 0 : index
    %c0_4 = arith.constant 0 : index
    %3 = vector.load %arg0[%c0_3, %c0_4] : memref<64x4xbf16, #tpu.memory_space<vmem>>, vector<64x4xbf16>
    %c0_5 = arith.constant 0 : index
    %c0_6 = arith.constant 0 : index
    %4 = vector.load %arg3[%c0_5, %c0_6] : memref<4x128xbf16, #tpu.memory_space<vmem>>, vector<4x128xbf16>
    %cst_7 = arith.constant dense<0.000000e+00> : vector<64x128xf32>
    %5 = tpu.matmul %3, %4, %cst_7 {dimension_numbers = #tpu.dot_dimension_numbers<[1], [0], [0], [1], [0, 0, 1, 1], [], []>} : vector<64x4xbf16>, vector<4x128xbf16>, vector<64x128xf32> -> vector<64x128xf32>
    %c0_8 = arith.constant 0 : index
    %c0_9 = arith.constant 0 : index
    %6 = vector.load %arg5[%c0_8, %c0_9] : memref<1x128xf32, #tpu.memory_space<vmem>>, vector<1x128xf32>
    %7 = vector.broadcast %6 : vector<1x128xf32> to vector<64x128xf32>
    %8 = arith.addf %5, %7 : vector<64x128xf32>
    %c0_10 = arith.constant 0 : index
    %c0_11 = arith.constant 0 : index
    %9 = vector.load %arg14[%c0_10, %c0_11] : memref<64x128xf32, #tpu.memory_space<vmem>>, vector<64x128xf32>
    tpu.vector_store %arg14[%c0_10, %c0_11], %8 {strides = array<i32>} : memref<64x128xf32, #tpu.memory_space<vmem>>, vector<64x128xf32>,
    %c0_12 = arith.constant 0 : index
    %c0_13 = arith.constant 0 : index
    %10 = vector.load %arg6[%c0_12, %c0_13] : memref<32x64xbf16, #tpu.memory_space<vmem>>, vector<32x64xbf16>
    %cst_14 = arith.constant dense<0.000000e+00> : vector<8x64xf32>
    %11 = tpu.matmul %0, %10, %cst_14 {dimension_numbers = #tpu.dot_dimension_numbers<[1], [0], [0], [1], [0, 0, 1, 1], [], []>} : vector<8x32xbf16>, vector<32x64xbf16>, vector<8x64xf32> -> vector<8x64xf32>
    %12 = math.tanh %11 : vector<8x64xf32>
    %13 = vector.extract_strided_slice %12 {offsets = [0, 0], sizes = [8, 32], strides = [1, 1]} : vector<8x64xf32> to vector<8x32xf32>
    %14 = vector.extract_strided_slice %12 {offsets = [0, 32], sizes = [8, 32], strides = [1, 1]} : vector<8x64xf32> to vector<8x32xf32>
    %c0_i32 = arith.constant 0 : i32
    %c8_i32 = arith.constant 8 : i32
    %15 = arith.muli %c0_i32, %c8_i32 : i32
    %16 = tpu.assume_multiple %15, 8 : i32
    %17 = arith.index_cast %16 : i32 to index
    %c0_15 = arith.constant 0 : index
    %18 = vector.load %arg14[%17, %c0_15] : memref<64x128xf32, #tpu.memory_space<vmem>>, vector<8x128xf32>
    %19 = arith.truncf %13 : vector<8x32xf32> to vector<8x32xbf16>
    %c0_16 = arith.constant 0 : index
    %c0_17 = arith.constant 0 : index
    %20 = vector.load %arg4[%c0_16, %c0_17] : memref<32x128xbf16, #tpu.memory_space<vmem>>, vector<32x128xbf16>
    %cst_18 = arith.constant dense<0.000000e+00> : vector<8x128xf32>
    %21 = tpu.matmul %19, %20, %cst_18 {dimension_numbers = #tpu.dot_dimension_numbers<[1], [0], [0], [1], [0, 0, 1, 1], [], []>} : vector<8x32xbf16>, vector<32x128xbf16>, vector<8x128xf32> -> vector<8x128xf32>
    %22 = arith.addf %18, %21 : vector<8x128xf32>
    %23 = vector.extract_strided_slice %22 {offsets = [0, 0], sizes = [8, 96], strides = [1, 1]} : vector<8x128xf32> to vector<8x96xf32>
    %24 = arith.negf %23 : vector<8x96xf32>
    %25 = math.exp %24 : vector<8x96xf32>
    %cst_19 = arith.constant 1.000000e+00 : f32
    %26 = vector.broadcast %cst_19 : f32 to vector<8x96xf32>
    %27 = arith.addf %26, %25 : vector<8x96xf32>
    %28 = arith.divf %26, %27 : vector<8x96xf32>
    %29 = vector.extract_strided_slice %22 {offsets = [0, 96], sizes = [8, 32], strides = [1, 1]} : vector<8x128xf32> to vector<8x32xf32>
    %30 = math.tanh %29 : vector<8x32xf32>
    %31 = vector.extract_strided_slice %28 {offsets = [0, 0], sizes = [8, 32], strides = [1, 1]} : vector<8x96xf32> to vector<8x32xf32>
    %32 = vector.extract_strided_slice %28 {offsets = [0, 32], sizes = [8, 32], strides = [1, 1]} : vector<8x96xf32> to vector<8x32xf32>
    %33 = vector.extract_strided_slice %28 {offsets = [0, 64], sizes = [8, 32], strides = [1, 1]} : vector<8x96xf32> to vector<8x32xf32>
    %34 = arith.mulf %32, %14 : vector<8x32xf32>
    %35 = arith.mulf %31, %30 : vector<8x32xf32>
    %36 = arith.addf %34, %35 : vector<8x32xf32>
    %37 = math.tanh %36 : vector<8x32xf32>
    %38 = arith.mulf %33, %37 : vector<8x32xf32>
    %39 = arith.index_cast %16 : i32 to index
    %c0_20 = arith.constant 0 : index
    %40 = vector.load %arg15[%39, %c0_20] : memref<64x32xf32, #tpu.memory_space<vmem>>, vector<8x32xf32>
    tpu.vector_store %arg15[%39, %c0_20], %38 {strides = array<i32>} : memref<64x32xf32, #tpu.memory_space<vmem>>, vector<8x32xf32>,
    %c1_i32 = arith.constant 1 : i32
    %c8_i32_21 = arith.constant 8 : i32
    %41 = arith.muli %c1_i32, %c8_i32_21 : i32
    %42 = tpu.assume_multiple %41, 8 : i32
    %43 = arith.index_cast %42 : i32 to index
    %c0_22 = arith.constant 0 : index
    %44 = vector.load %arg14[%43, %c0_22] : memref<64x128xf32, #tpu.memory_space<vmem>>, vector<8x128xf32>
    %45 = arith.truncf %38 : vector<8x32xf32> to vector<8x32xbf16>
    %c0_23 = arith.constant 0 : index
    %c0_24 = arith.constant 0 : index
    %46 = vector.load %arg4[%c0_23, %c0_24] : memref<32x128xbf16, #tpu.memory_space<vmem>>, vector<32x128xbf16>
    %cst_25 = arith.constant dense<0.000000e+00> : vector<8x128xf32>
    %47 = tpu.matmul %45, %46, %cst_25 {dimension_numbers = #tpu.dot_dimension_numbers<[1], [0], [0], [1], [0, 0, 1, 1], [], []>} : vector<8x32xbf16>, vector<32x128xbf16>, vector<8x128xf32> -> vector<8x128xf32>
    %48 = arith.addf %44, %47 : vector<8x128xf32>
    %49 = vector.extract_strided_slice %48 {offsets = [0, 0], sizes = [8, 96], strides = [1, 1]} : vector<8x128xf32> to vector<8x96xf32>
    %50 = arith.negf %49 : vector<8x96xf32>
    %51 = math.exp %50 : vector<8x96xf32>
    %cst_26 = arith.constant 1.000000e+00 : f32
    %52 = vector.broadcast %cst_26 : f32 to vector<8x96xf32>
    %53 = arith.addf %52, %51 : vector<8x96xf32>
    %54 = arith.divf %52, %53 : vector<8x96xf32>
    %55 = vector.extract_strided_slice %48 {offsets = [0, 96], sizes = [8, 32], strides = [1, 1]} : vector<8x128xf32> to vector<8x32xf32>
    %56 = math.tanh %55 : vector<8x32xf32>
    %57 = vector.extract_strided_slice %54 {offsets = [0, 0], sizes = [8, 32], strides = [1, 1]} : vector<8x96xf32> to vector<8x32xf32>
    %58 = vector.extract_strided_slice %54 {offsets = [0, 32], sizes = [8, 32], strides = [1, 1]} : vector<8x96xf32> to vector<8x32xf32>
    %59 = vector.extract_strided_slice %54 {offsets = [0, 64], sizes = [8, 32], strides = [1, 1]} : vector<8x96xf32> to vector<8x32xf32>
    %60 = arith.mulf %58, %36 : vector<8x32xf32>
    %61 = arith.mulf %57, %56 : vector<8x32xf32>
    %62 = arith.addf %60, %61 : vector<8x32xf32>
    %63 = math.tanh %62 : vector<8x32xf32>
    %64 = arith.mulf %59, %63 : vector<8x32xf32>
    %65 = arith.index_cast %42 : i32 to index
    %c0_27 = arith.constant 0 : index
    %66 = vector.load %arg15[%65, %c0_27] : memref<64x32xf32, #tpu.memory_space<vmem>>, vector<8x32xf32>
    tpu.vector_store %arg15[%65, %c0_27], %64 {strides = array<i32>} : memref<64x32xf32, #tpu.memory_space<vmem>>, vector<8x32xf32>,
    %c2_i32 = arith.constant 2 : i32
    %c8_i32_28 = arith.constant 8 : i32
    %67 = arith.muli %c2_i32, %c8_i32_28 : i32
    %68 = tpu.assume_multiple %67, 8 : i32
    %69 = arith.index_cast %68 : i32 to index
    %c0_29 = arith.constant 0 : index
    %70 = vector.load %arg14[%69, %c0_29] : memref<64x128xf32, #tpu.memory_space<vmem>>, vector<8x128xf32>
    %71 = arith.truncf %64 : vector<8x32xf32> to vector<8x32xbf16>
    %c0_30 = arith.constant 0 : index
    %c0_31 = arith.constant 0 : index
    %72 = vector.load %arg4[%c0_30, %c0_31] : memref<32x128xbf16, #tpu.memory_space<vmem>>, vector<32x128xbf16>
    %cst_32 = arith.constant dense<0.000000e+00> : vector<8x128xf32>
    %73 = tpu.matmul %71, %72, %cst_32 {dimension_numbers = #tpu.dot_dimension_numbers<[1], [0], [0], [1], [0, 0, 1, 1], [], []>} : vector<8x32xbf16>, vector<32x128xbf16>, vector<8x128xf32> -> vector<8x128xf32>
    %74 = arith.addf %70, %73 : vector<8x128xf32>
    %75 = vector.extract_strided_slice %74 {offsets = [0, 0], sizes = [8, 96], strides = [1, 1]} : vector<8x128xf32> to vector<8x96xf32>
    %76 = arith.negf %75 : vector<8x96xf32>
    %77 = math.exp %76 : vector<8x96xf32>
    %cst_33 = arith.constant 1.000000e+00 : f32
    %78 = vector.broadcast %cst_33 : f32 to vector<8x96xf32>
    %79 = arith.addf %78, %77 : vector<8x96xf32>
    %80 = arith.divf %78, %79 : vector<8x96xf32>
    %81 = vector.extract_strided_slice %74 {offsets = [0, 96], sizes = [8, 32], strides = [1, 1]} : vector<8x128xf32> to vector<8x32xf32>
    %82 = math.tanh %81 : vector<8x32xf32>
    %83 = vector.extract_strided_slice %80 {offsets = [0, 0], sizes = [8, 32], strides = [1, 1]} : vector<8x96xf32> to vector<8x32xf32>
    %84 = vector.extract_strided_slice %80 {offsets = [0, 32], sizes = [8, 32], strides = [1, 1]} : vector<8x96xf32> to vector<8x32xf32>
    %85 = vector.extract_strided_slice %80 {offsets = [0, 64], sizes = [8, 32], strides = [1, 1]} : vector<8x96xf32> to vector<8x32xf32>
    %86 = arith.mulf %84, %62 : vector<8x32xf32>
    %87 = arith.mulf %83, %82 : vector<8x32xf32>
    %88 = arith.addf %86, %87 : vector<8x32xf32>
    %89 = math.tanh %88 : vector<8x32xf32>
    %90 = arith.mulf %85, %89 : vector<8x32xf32>
    %91 = arith.index_cast %68 : i32 to index
    %c0_34 = arith.constant 0 : index
    %92 = vector.load %arg15[%91, %c0_34] : memref<64x32xf32, #tpu.memory_space<vmem>>, vector<8x32xf32>
    tpu.vector_store %arg15[%91, %c0_34], %90 {strides = array<i32>} : memref<64x32xf32, #tpu.memory_space<vmem>>, vector<8x32xf32>,
    %c3_i32 = arith.constant 3 : i32
    %c8_i32_35 = arith.constant 8 : i32
    %93 = arith.muli %c3_i32, %c8_i32_35 : i32
    %94 = tpu.assume_multiple %93, 8 : i32
    %95 = arith.index_cast %94 : i32 to index
    %c0_36 = arith.constant 0 : index
    %96 = vector.load %arg14[%95, %c0_36] : memref<64x128xf32, #tpu.memory_space<vmem>>, vector<8x128xf32>
    %97 = arith.truncf %90 : vector<8x32xf32> to vector<8x32xbf16>
    %c0_37 = arith.constant 0 : index
    %c0_38 = arith.constant 0 : index
    %98 = vector.load %arg4[%c0_37, %c0_38] : memref<32x128xbf16, #tpu.memory_space<vmem>>, vector<32x128xbf16>
    %cst_39 = arith.constant dense<0.000000e+00> : vector<8x128xf32>
    %99 = tpu.matmul %97, %98, %cst_39 {dimension_numbers = #tpu.dot_dimension_numbers<[1], [0], [0], [1], [0, 0, 1, 1], [], []>} : vector<8x32xbf16>, vector<32x128xbf16>, vector<8x128xf32> -> vector<8x128xf32>
    %100 = arith.addf %96, %99 : vector<8x128xf32>
    %101 = vector.extract_strided_slice %100 {offsets = [0, 0], sizes = [8, 96], strides = [1, 1]} : vector<8x128xf32> to vector<8x96xf32>
    %102 = arith.negf %101 : vector<8x96xf32>
    %103 = math.exp %102 : vector<8x96xf32>
    %cst_40 = arith.constant 1.000000e+00 : f32
    %104 = vector.broadcast %cst_40 : f32 to vector<8x96xf32>
    %105 = arith.addf %104, %103 : vector<8x96xf32>
    %106 = arith.divf %104, %105 : vector<8x96xf32>
    %107 = vector.extract_strided_slice %100 {offsets = [0, 96], sizes = [8, 32], strides = [1, 1]} : vector<8x128xf32> to vector<8x32xf32>
    %108 = math.tanh %107 : vector<8x32xf32>
    %109 = vector.extract_strided_slice %106 {offsets = [0, 0], sizes = [8, 32], strides = [1, 1]} : vector<8x96xf32> to vector<8x32xf32>
    %110 = vector.extract_strided_slice %106 {offsets = [0, 32], sizes = [8, 32], strides = [1, 1]} : vector<8x96xf32> to vector<8x32xf32>
    %111 = vector.extract_strided_slice %106 {offsets = [0, 64], sizes = [8, 32], strides = [1, 1]} : vector<8x96xf32> to vector<8x32xf32>
    %112 = arith.mulf %110, %88 : vector<8x32xf32>
    %113 = arith.mulf %109, %108 : vector<8x32xf32>
    %114 = arith.addf %112, %113 : vector<8x32xf32>
    %115 = math.tanh %114 : vector<8x32xf32>
    %116 = arith.mulf %111, %115 : vector<8x32xf32>
    %117 = arith.index_cast %94 : i32 to index
    %c0_41 = arith.constant 0 : index
    %118 = vector.load %arg15[%117, %c0_41] : memref<64x32xf32, #tpu.memory_space<vmem>>, vector<8x32xf32>
    tpu.vector_store %arg15[%117, %c0_41], %116 {strides = array<i32>} : memref<64x32xf32, #tpu.memory_space<vmem>>, vector<8x32xf32>,
    %c4_i32 = arith.constant 4 : i32
    %c8_i32_42 = arith.constant 8 : i32
    %119 = arith.muli %c4_i32, %c8_i32_42 : i32
    %120 = tpu.assume_multiple %119, 8 : i32
    %121 = arith.index_cast %120 : i32 to index
    %c0_43 = arith.constant 0 : index
    %122 = vector.load %arg14[%121, %c0_43] : memref<64x128xf32, #tpu.memory_space<vmem>>, vector<8x128xf32>
    %123 = arith.truncf %116 : vector<8x32xf32> to vector<8x32xbf16>
    %c0_44 = arith.constant 0 : index
    %c0_45 = arith.constant 0 : index
    %124 = vector.load %arg4[%c0_44, %c0_45] : memref<32x128xbf16, #tpu.memory_space<vmem>>, vector<32x128xbf16>
    %cst_46 = arith.constant dense<0.000000e+00> : vector<8x128xf32>
    %125 = tpu.matmul %123, %124, %cst_46 {dimension_numbers = #tpu.dot_dimension_numbers<[1], [0], [0], [1], [0, 0, 1, 1], [], []>} : vector<8x32xbf16>, vector<32x128xbf16>, vector<8x128xf32> -> vector<8x128xf32>
    %126 = arith.addf %122, %125 : vector<8x128xf32>
    %127 = vector.extract_strided_slice %126 {offsets = [0, 0], sizes = [8, 96], strides = [1, 1]} : vector<8x128xf32> to vector<8x96xf32>
    %128 = arith.negf %127 : vector<8x96xf32>
    %129 = math.exp %128 : vector<8x96xf32>
    %cst_47 = arith.constant 1.000000e+00 : f32
    %130 = vector.broadcast %cst_47 : f32 to vector<8x96xf32>
    %131 = arith.addf %130, %129 : vector<8x96xf32>
    %132 = arith.divf %130, %131 : vector<8x96xf32>
    %133 = vector.extract_strided_slice %126 {offsets = [0, 96], sizes = [8, 32], strides = [1, 1]} : vector<8x128xf32> to vector<8x32xf32>
    %134 = math.tanh %133 : vector<8x32xf32>
    %135 = vector.extract_strided_slice %132 {offsets = [0, 0], sizes = [8, 32], strides = [1, 1]} : vector<8x96xf32> to vector<8x32xf32>
    %136 = vector.extract_strided_slice %132 {offsets = [0, 32], sizes = [8, 32], strides = [1, 1]} : vector<8x96xf32> to vector<8x32xf32>
    %137 = vector.extract_strided_slice %132 {offsets = [0, 64], sizes = [8, 32], strides = [1, 1]} : vector<8x96xf32> to vector<8x32xf32>
    %138 = arith.mulf %136, %114 : vector<8x32xf32>
    %139 = arith.mulf %135, %134 : vector<8x32xf32>
    %140 = arith.addf %138, %139 : vector<8x32xf32>
    %141 = math.tanh %140 : vector<8x32xf32>
    %142 = arith.mulf %137, %141 : vector<8x32xf32>
    %143 = arith.index_cast %120 : i32 to index
    %c0_48 = arith.constant 0 : index
    %144 = vector.load %arg15[%143, %c0_48] : memref<64x32xf32, #tpu.memory_space<vmem>>, vector<8x32xf32>
    tpu.vector_store %arg15[%143, %c0_48], %142 {strides = array<i32>} : memref<64x32xf32, #tpu.memory_space<vmem>>, vector<8x32xf32>,
    %c5_i32 = arith.constant 5 : i32
    %c8_i32_49 = arith.constant 8 : i32
    %145 = arith.muli %c5_i32, %c8_i32_49 : i32
    %146 = tpu.assume_multiple %145, 8 : i32
    %147 = arith.index_cast %146 : i32 to index
    %c0_50 = arith.constant 0 : index
    %148 = vector.load %arg14[%147, %c0_50] : memref<64x128xf32, #tpu.memory_space<vmem>>, vector<8x128xf32>
    %149 = arith.truncf %142 : vector<8x32xf32> to vector<8x32xbf16>
    %c0_51 = arith.constant 0 : index
    %c0_52 = arith.constant 0 : index
    %150 = vector.load %arg4[%c0_51, %c0_52] : memref<32x128xbf16, #tpu.memory_space<vmem>>, vector<32x128xbf16>
    %cst_53 = arith.constant dense<0.000000e+00> : vector<8x128xf32>
    %151 = tpu.matmul %149, %150, %cst_53 {dimension_numbers = #tpu.dot_dimension_numbers<[1], [0], [0], [1], [0, 0, 1, 1], [], []>} : vector<8x32xbf16>, vector<32x128xbf16>, vector<8x128xf32> -> vector<8x128xf32>
    %152 = arith.addf %148, %151 : vector<8x128xf32>
    %153 = vector.extract_strided_slice %152 {offsets = [0, 0], sizes = [8, 96], strides = [1, 1]} : vector<8x128xf32> to vector<8x96xf32>
    %154 = arith.negf %153 : vector<8x96xf32>
    %155 = math.exp %154 : vector<8x96xf32>
    %cst_54 = arith.constant 1.000000e+00 : f32
    %156 = vector.broadcast %cst_54 : f32 to vector<8x96xf32>
    %157 = arith.addf %156, %155 : vector<8x96xf32>
    %158 = arith.divf %156, %157 : vector<8x96xf32>
    %159 = vector.extract_strided_slice %152 {offsets = [0, 96], sizes = [8, 32], strides = [1, 1]} : vector<8x128xf32> to vector<8x32xf32>
    %160 = math.tanh %159 : vector<8x32xf32>
    %161 = vector.extract_strided_slice %158 {offsets = [0, 0], sizes = [8, 32], strides = [1, 1]} : vector<8x96xf32> to vector<8x32xf32>
    %162 = vector.extract_strided_slice %158 {offsets = [0, 32], sizes = [8, 32], strides = [1, 1]} : vector<8x96xf32> to vector<8x32xf32>
    %163 = vector.extract_strided_slice %158 {offsets = [0, 64], sizes = [8, 32], strides = [1, 1]} : vector<8x96xf32> to vector<8x32xf32>
    %164 = arith.mulf %162, %140 : vector<8x32xf32>
    %165 = arith.mulf %161, %160 : vector<8x32xf32>
    %166 = arith.addf %164, %165 : vector<8x32xf32>
    %167 = math.tanh %166 : vector<8x32xf32>
    %168 = arith.mulf %163, %167 : vector<8x32xf32>
    %169 = arith.index_cast %146 : i32 to index
    %c0_55 = arith.constant 0 : index
    %170 = vector.load %arg15[%169, %c0_55] : memref<64x32xf32, #tpu.memory_space<vmem>>, vector<8x32xf32>
    tpu.vector_store %arg15[%169, %c0_55], %168 {strides = array<i32>} : memref<64x32xf32, #tpu.memory_space<vmem>>, vector<8x32xf32>,
    %c6_i32 = arith.constant 6 : i32
    %c8_i32_56 = arith.constant 8 : i32
    %171 = arith.muli %c6_i32, %c8_i32_56 : i32
    %172 = tpu.assume_multiple %171, 8 : i32
    %173 = arith.index_cast %172 : i32 to index
    %c0_57 = arith.constant 0 : index
    %174 = vector.load %arg14[%173, %c0_57] : memref<64x128xf32, #tpu.memory_space<vmem>>, vector<8x128xf32>
    %175 = arith.truncf %168 : vector<8x32xf32> to vector<8x32xbf16>
    %c0_58 = arith.constant 0 : index
    %c0_59 = arith.constant 0 : index
    %176 = vector.load %arg4[%c0_58, %c0_59] : memref<32x128xbf16, #tpu.memory_space<vmem>>, vector<32x128xbf16>
    %cst_60 = arith.constant dense<0.000000e+00> : vector<8x128xf32>
    %177 = tpu.matmul %175, %176, %cst_60 {dimension_numbers = #tpu.dot_dimension_numbers<[1], [0], [0], [1], [0, 0, 1, 1], [], []>} : vector<8x32xbf16>, vector<32x128xbf16>, vector<8x128xf32> -> vector<8x128xf32>
    %178 = arith.addf %174, %177 : vector<8x128xf32>
    %179 = vector.extract_strided_slice %178 {offsets = [0, 0], sizes = [8, 96], strides = [1, 1]} : vector<8x128xf32> to vector<8x96xf32>
    %180 = arith.negf %179 : vector<8x96xf32>
    %181 = math.exp %180 : vector<8x96xf32>
    %cst_61 = arith.constant 1.000000e+00 : f32
    %182 = vector.broadcast %cst_61 : f32 to vector<8x96xf32>
    %183 = arith.addf %182, %181 : vector<8x96xf32>
    %184 = arith.divf %182, %183 : vector<8x96xf32>
    %185 = vector.extract_strided_slice %178 {offsets = [0, 96], sizes = [8, 32], strides = [1, 1]} : vector<8x128xf32> to vector<8x32xf32>
    %186 = math.tanh %185 : vector<8x32xf32>
    %187 = vector.extract_strided_slice %184 {offsets = [0, 0], sizes = [8, 32], strides = [1, 1]} : vector<8x96xf32> to vector<8x32xf32>
    %188 = vector.extract_strided_slice %184 {offsets = [0, 32], sizes = [8, 32], strides = [1, 1]} : vector<8x96xf32> to vector<8x32xf32>
    %189 = vector.extract_strided_slice %184 {offsets = [0, 64], sizes = [8, 32], strides = [1, 1]} : vector<8x96xf32> to vector<8x32xf32>
    %190 = arith.mulf %188, %166 : vector<8x32xf32>
    %191 = arith.mulf %187, %186 : vector<8x32xf32>
    %192 = arith.addf %190, %191 : vector<8x32xf32>
    %193 = math.tanh %192 : vector<8x32xf32>
    %194 = arith.mulf %189, %193 : vector<8x32xf32>
    %195 = arith.index_cast %172 : i32 to index
    %c0_62 = arith.constant 0 : index
    %196 = vector.load %arg15[%195, %c0_62] : memref<64x32xf32, #tpu.memory_space<vmem>>, vector<8x32xf32>
    tpu.vector_store %arg15[%195, %c0_62], %194 {strides = array<i32>} : memref<64x32xf32, #tpu.memory_space<vmem>>, vector<8x32xf32>,
    %c7_i32 = arith.constant 7 : i32
    %c8_i32_63 = arith.constant 8 : i32
    %197 = arith.muli %c7_i32, %c8_i32_63 : i32
    %198 = tpu.assume_multiple %197, 8 : i32
    %199 = arith.index_cast %198 : i32 to index
    %c0_64 = arith.constant 0 : index
    %200 = vector.load %arg14[%199, %c0_64] : memref<64x128xf32, #tpu.memory_space<vmem>>, vector<8x128xf32>
    %201 = arith.truncf %194 : vector<8x32xf32> to vector<8x32xbf16>
    %c0_65 = arith.constant 0 : index
    %c0_66 = arith.constant 0 : index
    %202 = vector.load %arg4[%c0_65, %c0_66] : memref<32x128xbf16, #tpu.memory_space<vmem>>, vector<32x128xbf16>
    %cst_67 = arith.constant dense<0.000000e+00> : vector<8x128xf32>
    %203 = tpu.matmul %201, %202, %cst_67 {dimension_numbers = #tpu.dot_dimension_numbers<[1], [0], [0], [1], [0, 0, 1, 1], [], []>} : vector<8x32xbf16>, vector<32x128xbf16>, vector<8x128xf32> -> vector<8x128xf32>
    %204 = arith.addf %200, %203 : vector<8x128xf32>
    %205 = vector.extract_strided_slice %204 {offsets = [0, 0], sizes = [8, 96], strides = [1, 1]} : vector<8x128xf32> to vector<8x96xf32>
    %206 = arith.negf %205 : vector<8x96xf32>
    %207 = math.exp %206 : vector<8x96xf32>
    %cst_68 = arith.constant 1.000000e+00 : f32
    %208 = vector.broadcast %cst_68 : f32 to vector<8x96xf32>
    %209 = arith.addf %208, %207 : vector<8x96xf32>
    %210 = arith.divf %208, %209 : vector<8x96xf32>
    %211 = vector.extract_strided_slice %204 {offsets = [0, 96], sizes = [8, 32], strides = [1, 1]} : vector<8x128xf32> to vector<8x32xf32>
    %212 = math.tanh %211 : vector<8x32xf32>
    %213 = vector.extract_strided_slice %210 {offsets = [0, 0], sizes = [8, 32], strides = [1, 1]} : vector<8x96xf32> to vector<8x32xf32>
    %214 = vector.extract_strided_slice %210 {offsets = [0, 32], sizes = [8, 32], strides = [1, 1]} : vector<8x96xf32> to vector<8x32xf32>
    %215 = vector.extract_strided_slice %210 {offsets = [0, 64], sizes = [8, 32], strides = [1, 1]} : vector<8x96xf32> to vector<8x32xf32>
    %216 = arith.mulf %214, %192 : vector<8x32xf32>
    %217 = arith.mulf %213, %212 : vector<8x32xf32>
    %218 = arith.addf %216, %217 : vector<8x32xf32>
    %219 = math.tanh %218 : vector<8x32xf32>
    %220 = arith.mulf %215, %219 : vector<8x32xf32>
    %221 = arith.index_cast %198 : i32 to index
    %c0_69 = arith.constant 0 : index
    %222 = vector.load %arg15[%221, %c0_69] : memref<64x32xf32, #tpu.memory_space<vmem>>, vector<8x32xf32>
    tpu.vector_store %arg15[%221, %c0_69], %220 {strides = array<i32>} : memref<64x32xf32, #tpu.memory_space<vmem>>, vector<8x32xf32>,
    %c8_i32_70 = arith.constant 8 : i32
    %c0_71 = arith.constant 0 : index
    %c0_72 = arith.constant 0 : index
    %223 = vector.load %arg15[%c0_71, %c0_72] : memref<64x32xf32, #tpu.memory_space<vmem>>, vector<64x32xf32>
    %224 = arith.truncf %223 : vector<64x32xf32> to vector<64x32xbf16>
    %c0_73 = arith.constant 0 : index
    %c0_74 = arith.constant 0 : index
    %225 = vector.load %arg7[%c0_73, %c0_74] : memref<32x128xbf16, #tpu.memory_space<vmem>>, vector<32x128xbf16>
    %cst_75 = arith.constant dense<0.000000e+00> : vector<64x128xf32>
    %226 = tpu.matmul %224, %225, %cst_75 {dimension_numbers = #tpu.dot_dimension_numbers<[1], [0], [0], [1], [0, 0, 1, 1], [], []>} : vector<64x32xbf16>, vector<32x128xbf16>, vector<64x128xf32> -> vector<64x128xf32>
    %c0_76 = arith.constant 0 : index
    %c0_77 = arith.constant 0 : index
    %227 = vector.load %arg9[%c0_76, %c0_77] : memref<1x128xf32, #tpu.memory_space<vmem>>, vector<1x128xf32>
    %228 = vector.broadcast %227 : vector<1x128xf32> to vector<64x128xf32>
    %229 = arith.addf %226, %228 : vector<64x128xf32>
    %c0_78 = arith.constant 0 : index
    %c0_79 = arith.constant 0 : index
    %230 = vector.load %arg14[%c0_78, %c0_79] : memref<64x128xf32, #tpu.memory_space<vmem>>, vector<64x128xf32>
    tpu.vector_store %arg14[%c0_78, %c0_79], %229 {strides = array<i32>} : memref<64x128xf32, #tpu.memory_space<vmem>>, vector<64x128xf32>,
    %c0_80 = arith.constant 0 : index
    %c0_81 = arith.constant 0 : index
    %231 = vector.load %arg10[%c0_80, %c0_81] : memref<32x64xbf16, #tpu.memory_space<vmem>>, vector<32x64xbf16>
    %cst_82 = arith.constant dense<0.000000e+00> : vector<8x64xf32>
    %232 = tpu.matmul %0, %231, %cst_82 {dimension_numbers = #tpu.dot_dimension_numbers<[1], [0], [0], [1], [0, 0, 1, 1], [], []>} : vector<8x32xbf16>, vector<32x64xbf16>, vector<8x64xf32> -> vector<8x64xf32>
    %233 = math.tanh %232 : vector<8x64xf32>
    %234 = vector.extract_strided_slice %233 {offsets = [0, 0], sizes = [8, 32], strides = [1, 1]} : vector<8x64xf32> to vector<8x32xf32>
    %235 = vector.extract_strided_slice %233 {offsets = [0, 32], sizes = [8, 32], strides = [1, 1]} : vector<8x64xf32> to vector<8x32xf32>
    %c0_i32_83 = arith.constant 0 : i32
    %c8_i32_84 = arith.constant 8 : i32
    %236 = arith.muli %c0_i32_83, %c8_i32_84 : i32
    %237 = tpu.assume_multiple %236, 8 : i32
    %238 = arith.index_cast %237 : i32 to index
    %c0_85 = arith.constant 0 : index
    %239 = vector.load %arg14[%238, %c0_85] : memref<64x128xf32, #tpu.memory_space<vmem>>, vector<8x128xf32>
    %240 = arith.truncf %234 : vector<8x32xf32> to vector<8x32xbf16>
    %c0_86 = arith.constant 0 : index
    %c0_87 = arith.constant 0 : index
    %241 = vector.load %arg8[%c0_86, %c0_87] : memref<32x128xbf16, #tpu.memory_space<vmem>>, vector<32x128xbf16>
    %cst_88 = arith.constant dense<0.000000e+00> : vector<8x128xf32>
    %242 = tpu.matmul %240, %241, %cst_88 {dimension_numbers = #tpu.dot_dimension_numbers<[1], [0], [0], [1], [0, 0, 1, 1], [], []>} : vector<8x32xbf16>, vector<32x128xbf16>, vector<8x128xf32> -> vector<8x128xf32>
    %243 = arith.addf %239, %242 : vector<8x128xf32>
    %244 = vector.extract_strided_slice %243 {offsets = [0, 0], sizes = [8, 96], strides = [1, 1]} : vector<8x128xf32> to vector<8x96xf32>
    %245 = arith.negf %244 : vector<8x96xf32>
    %246 = math.exp %245 : vector<8x96xf32>
    %cst_89 = arith.constant 1.000000e+00 : f32
    %247 = vector.broadcast %cst_89 : f32 to vector<8x96xf32>
    %248 = arith.addf %247, %246 : vector<8x96xf32>
    %249 = arith.divf %247, %248 : vector<8x96xf32>
    %250 = vector.extract_strided_slice %243 {offsets = [0, 96], sizes = [8, 32], strides = [1, 1]} : vector<8x128xf32> to vector<8x32xf32>
    %251 = math.tanh %250 : vector<8x32xf32>
    %252 = vector.extract_strided_slice %249 {offsets = [0, 0], sizes = [8, 32], strides = [1, 1]} : vector<8x96xf32> to vector<8x32xf32>
    %253 = vector.extract_strided_slice %249 {offsets = [0, 32], sizes = [8, 32], strides = [1, 1]} : vector<8x96xf32> to vector<8x32xf32>
    %254 = vector.extract_strided_slice %249 {offsets = [0, 64], sizes = [8, 32], strides = [1, 1]} : vector<8x96xf32> to vector<8x32xf32>
    %255 = arith.mulf %253, %235 : vector<8x32xf32>
    %256 = arith.mulf %252, %251 : vector<8x32xf32>
    %257 = arith.addf %255, %256 : vector<8x32xf32>
    %258 = math.tanh %257 : vector<8x32xf32>
    %259 = arith.mulf %254, %258 : vector<8x32xf32>
    %260 = vector.broadcast %c0_i32_83 : i32 to vector<8x1xi32>
    %261 = arith.cmpi eq, %1, %260 : vector<8x1xi32>
    %262 = vector.shape_cast %261 : vector<8x1xi1> to vector<8x1xi1>
    %263 = vector.broadcast %262 : vector<8x1xi1> to vector<8x32xi1>
    %264 = arith.select %263, %259, %2 : vector<8x32xi1>, vector<8x32xf32>
    %c1_i32_90 = arith.constant 1 : i32
    %c8_i32_91 = arith.constant 8 : i32
    %265 = arith.muli %c1_i32_90, %c8_i32_91 : i32
    %266 = tpu.assume_multiple %265, 8 : i32
    %267 = arith.index_cast %266 : i32 to index
    %c0_92 = arith.constant 0 : index
    %268 = vector.load %arg14[%267, %c0_92] : memref<64x128xf32, #tpu.memory_space<vmem>>, vector<8x128xf32>
    %269 = arith.truncf %259 : vector<8x32xf32> to vector<8x32xbf16>
    %c0_93 = arith.constant 0 : index
    %c0_94 = arith.constant 0 : index
    %270 = vector.load %arg8[%c0_93, %c0_94] : memref<32x128xbf16, #tpu.memory_space<vmem>>, vector<32x128xbf16>
    %cst_95 = arith.constant dense<0.000000e+00> : vector<8x128xf32>
    %271 = tpu.matmul %269, %270, %cst_95 {dimension_numbers = #tpu.dot_dimension_numbers<[1], [0], [0], [1], [0, 0, 1, 1], [], []>} : vector<8x32xbf16>, vector<32x128xbf16>, vector<8x128xf32> -> vector<8x128xf32>
    %272 = arith.addf %268, %271 : vector<8x128xf32>
    %273 = vector.extract_strided_slice %272 {offsets = [0, 0], sizes = [8, 96], strides = [1, 1]} : vector<8x128xf32> to vector<8x96xf32>
    %274 = arith.negf %273 : vector<8x96xf32>
    %275 = math.exp %274 : vector<8x96xf32>
    %cst_96 = arith.constant 1.000000e+00 : f32
    %276 = vector.broadcast %cst_96 : f32 to vector<8x96xf32>
    %277 = arith.addf %276, %275 : vector<8x96xf32>
    %278 = arith.divf %276, %277 : vector<8x96xf32>
    %279 = vector.extract_strided_slice %272 {offsets = [0, 96], sizes = [8, 32], strides = [1, 1]} : vector<8x128xf32> to vector<8x32xf32>
    %280 = math.tanh %279 : vector<8x32xf32>
    %281 = vector.extract_strided_slice %278 {offsets = [0, 0], sizes = [8, 32], strides = [1, 1]} : vector<8x96xf32> to vector<8x32xf32>
    %282 = vector.extract_strided_slice %278 {offsets = [0, 32], sizes = [8, 32], strides = [1, 1]} : vector<8x96xf32> to vector<8x32xf32>
    %283 = vector.extract_strided_slice %278 {offsets = [0, 64], sizes = [8, 32], strides = [1, 1]} : vector<8x96xf32> to vector<8x32xf32>
    %284 = arith.mulf %282, %257 : vector<8x32xf32>
    %285 = arith.mulf %281, %280 : vector<8x32xf32>
    %286 = arith.addf %284, %285 : vector<8x32xf32>
    %287 = math.tanh %286 : vector<8x32xf32>
    %288 = arith.mulf %283, %287 : vector<8x32xf32>
    %289 = vector.broadcast %c1_i32_90 : i32 to vector<8x1xi32>
    %290 = arith.cmpi eq, %1, %289 : vector<8x1xi32>
    %291 = vector.shape_cast %290 : vector<8x1xi1> to vector<8x1xi1>
    %292 = vector.broadcast %291 : vector<8x1xi1> to vector<8x32xi1>
    %293 = arith.select %292, %288, %264 : vector<8x32xi1>, vector<8x32xf32>
    %c2_i32_97 = arith.constant 2 : i32
    %c8_i32_98 = arith.constant 8 : i32
    %294 = arith.muli %c2_i32_97, %c8_i32_98 : i32
    %295 = tpu.assume_multiple %294, 8 : i32
    %296 = arith.index_cast %295 : i32 to index
    %c0_99 = arith.constant 0 : index
    %297 = vector.load %arg14[%296, %c0_99] : memref<64x128xf32, #tpu.memory_space<vmem>>, vector<8x128xf32>
    %298 = arith.truncf %288 : vector<8x32xf32> to vector<8x32xbf16>
    %c0_100 = arith.constant 0 : index
    %c0_101 = arith.constant 0 : index
    %299 = vector.load %arg8[%c0_100, %c0_101] : memref<32x128xbf16, #tpu.memory_space<vmem>>, vector<32x128xbf16>
    %cst_102 = arith.constant dense<0.000000e+00> : vector<8x128xf32>
    %300 = tpu.matmul %298, %299, %cst_102 {dimension_numbers = #tpu.dot_dimension_numbers<[1], [0], [0], [1], [0, 0, 1, 1], [], []>} : vector<8x32xbf16>, vector<32x128xbf16>, vector<8x128xf32> -> vector<8x128xf32>
    %301 = arith.addf %297, %300 : vector<8x128xf32>
    %302 = vector.extract_strided_slice %301 {offsets = [0, 0], sizes = [8, 96], strides = [1, 1]} : vector<8x128xf32> to vector<8x96xf32>
    %303 = arith.negf %302 : vector<8x96xf32>
    %304 = math.exp %303 : vector<8x96xf32>
    %cst_103 = arith.constant 1.000000e+00 : f32
    %305 = vector.broadcast %cst_103 : f32 to vector<8x96xf32>
    %306 = arith.addf %305, %304 : vector<8x96xf32>
    %307 = arith.divf %305, %306 : vector<8x96xf32>
    %308 = vector.extract_strided_slice %301 {offsets = [0, 96], sizes = [8, 32], strides = [1, 1]} : vector<8x128xf32> to vector<8x32xf32>
    %309 = math.tanh %308 : vector<8x32xf32>
    %310 = vector.extract_strided_slice %307 {offsets = [0, 0], sizes = [8, 32], strides = [1, 1]} : vector<8x96xf32> to vector<8x32xf32>
    %311 = vector.extract_strided_slice %307 {offsets = [0, 32], sizes = [8, 32], strides = [1, 1]} : vector<8x96xf32> to vector<8x32xf32>
    %312 = vector.extract_strided_slice %307 {offsets = [0, 64], sizes = [8, 32], strides = [1, 1]} : vector<8x96xf32> to vector<8x32xf32>
    %313 = arith.mulf %311, %286 : vector<8x32xf32>
    %314 = arith.mulf %310, %309 : vector<8x32xf32>
    %315 = arith.addf %313, %314 : vector<8x32xf32>
    %316 = math.tanh %315 : vector<8x32xf32>
    %317 = arith.mulf %312, %316 : vector<8x32xf32>
    %318 = vector.broadcast %c2_i32_97 : i32 to vector<8x1xi32>
    %319 = arith.cmpi eq, %1, %318 : vector<8x1xi32>
    %320 = vector.shape_cast %319 : vector<8x1xi1> to vector<8x1xi1>
    %321 = vector.broadcast %320 : vector<8x1xi1> to vector<8x32xi1>
    %322 = arith.select %321, %317, %293 : vector<8x32xi1>, vector<8x32xf32>
    %c3_i32_104 = arith.constant 3 : i32
    %c8_i32_105 = arith.constant 8 : i32
    %323 = arith.muli %c3_i32_104, %c8_i32_105 : i32
    %324 = tpu.assume_multiple %323, 8 : i32
    %325 = arith.index_cast %324 : i32 to index
    %c0_106 = arith.constant 0 : index
    %326 = vector.load %arg14[%325, %c0_106] : memref<64x128xf32, #tpu.memory_space<vmem>>, vector<8x128xf32>
    %327 = arith.truncf %317 : vector<8x32xf32> to vector<8x32xbf16>
    %c0_107 = arith.constant 0 : index
    %c0_108 = arith.constant 0 : index
    %328 = vector.load %arg8[%c0_107, %c0_108] : memref<32x128xbf16, #tpu.memory_space<vmem>>, vector<32x128xbf16>
    %cst_109 = arith.constant dense<0.000000e+00> : vector<8x128xf32>
    %329 = tpu.matmul %327, %328, %cst_109 {dimension_numbers = #tpu.dot_dimension_numbers<[1], [0], [0], [1], [0, 0, 1, 1], [], []>} : vector<8x32xbf16>, vector<32x128xbf16>, vector<8x128xf32> -> vector<8x128xf32>
    %330 = arith.addf %326, %329 : vector<8x128xf32>
    %331 = vector.extract_strided_slice %330 {offsets = [0, 0], sizes = [8, 96], strides = [1, 1]} : vector<8x128xf32> to vector<8x96xf32>
    %332 = arith.negf %331 : vector<8x96xf32>
    %333 = math.exp %332 : vector<8x96xf32>
    %cst_110 = arith.constant 1.000000e+00 : f32
    %334 = vector.broadcast %cst_110 : f32 to vector<8x96xf32>
    %335 = arith.addf %334, %333 : vector<8x96xf32>
    %336 = arith.divf %334, %335 : vector<8x96xf32>
    %337 = vector.extract_strided_slice %330 {offsets = [0, 96], sizes = [8, 32], strides = [1, 1]} : vector<8x128xf32> to vector<8x32xf32>
    %338 = math.tanh %337 : vector<8x32xf32>
    %339 = vector.extract_strided_slice %336 {offsets = [0, 0], sizes = [8, 32], strides = [1, 1]} : vector<8x96xf32> to vector<8x32xf32>
    %340 = vector.extract_strided_slice %336 {offsets = [0, 32], sizes = [8, 32], strides = [1, 1]} : vector<8x96xf32> to vector<8x32xf32>
    %341 = vector.extract_strided_slice %336 {offsets = [0, 64], sizes = [8, 32], strides = [1, 1]} : vector<8x96xf32> to vector<8x32xf32>
    %342 = arith.mulf %340, %315 : vector<8x32xf32>
    %343 = arith.mulf %339, %338 : vector<8x32xf32>
    %344 = arith.addf %342, %343 : vector<8x32xf32>
    %345 = math.tanh %344 : vector<8x32xf32>
    %346 = arith.mulf %341, %345 : vector<8x32xf32>
    %347 = vector.broadcast %c3_i32_104 : i32 to vector<8x1xi32>
    %348 = arith.cmpi eq, %1, %347 : vector<8x1xi32>
    %349 = vector.shape_cast %348 : vector<8x1xi1> to vector<8x1xi1>
    %350 = vector.broadcast %349 : vector<8x1xi1> to vector<8x32xi1>
    %351 = arith.select %350, %346, %322 : vector<8x32xi1>, vector<8x32xf32>
    %c4_i32_111 = arith.constant 4 : i32
    %c8_i32_112 = arith.constant 8 : i32
    %352 = arith.muli %c4_i32_111, %c8_i32_112 : i32
    %353 = tpu.assume_multiple %352, 8 : i32
    %354 = arith.index_cast %353 : i32 to index
    %c0_113 = arith.constant 0 : index
    %355 = vector.load %arg14[%354, %c0_113] : memref<64x128xf32, #tpu.memory_space<vmem>>, vector<8x128xf32>
    %356 = arith.truncf %346 : vector<8x32xf32> to vector<8x32xbf16>
    %c0_114 = arith.constant 0 : index
    %c0_115 = arith.constant 0 : index
    %357 = vector.load %arg8[%c0_114, %c0_115] : memref<32x128xbf16, #tpu.memory_space<vmem>>, vector<32x128xbf16>
    %cst_116 = arith.constant dense<0.000000e+00> : vector<8x128xf32>
    %358 = tpu.matmul %356, %357, %cst_116 {dimension_numbers = #tpu.dot_dimension_numbers<[1], [0], [0], [1], [0, 0, 1, 1], [], []>} : vector<8x32xbf16>, vector<32x128xbf16>, vector<8x128xf32> -> vector<8x128xf32>
    %359 = arith.addf %355, %358 : vector<8x128xf32>
    %360 = vector.extract_strided_slice %359 {offsets = [0, 0], sizes = [8, 96], strides = [1, 1]} : vector<8x128xf32> to vector<8x96xf32>
    %361 = arith.negf %360 : vector<8x96xf32>
    %362 = math.exp %361 : vector<8x96xf32>
    %cst_117 = arith.constant 1.000000e+00 : f32
    %363 = vector.broadcast %cst_117 : f32 to vector<8x96xf32>
    %364 = arith.addf %363, %362 : vector<8x96xf32>
    %365 = arith.divf %363, %364 : vector<8x96xf32>
    %366 = vector.extract_strided_slice %359 {offsets = [0, 96], sizes = [8, 32], strides = [1, 1]} : vector<8x128xf32> to vector<8x32xf32>
    %367 = math.tanh %366 : vector<8x32xf32>
    %368 = vector.extract_strided_slice %365 {offsets = [0, 0], sizes = [8, 32], strides = [1, 1]} : vector<8x96xf32> to vector<8x32xf32>
    %369 = vector.extract_strided_slice %365 {offsets = [0, 32], sizes = [8, 32], strides = [1, 1]} : vector<8x96xf32> to vector<8x32xf32>
    %370 = vector.extract_strided_slice %365 {offsets = [0, 64], sizes = [8, 32], strides = [1, 1]} : vector<8x96xf32> to vector<8x32xf32>
    %371 = arith.mulf %369, %344 : vector<8x32xf32>
    %372 = arith.mulf %368, %367 : vector<8x32xf32>
    %373 = arith.addf %371, %372 : vector<8x32xf32>
    %374 = math.tanh %373 : vector<8x32xf32>
    %375 = arith.mulf %370, %374 : vector<8x32xf32>
    %376 = vector.broadcast %c4_i32_111 : i32 to vector<8x1xi32>
    %377 = arith.cmpi eq, %1, %376 : vector<8x1xi32>
    %378 = vector.shape_cast %377 : vector<8x1xi1> to vector<8x1xi1>
    %379 = vector.broadcast %378 : vector<8x1xi1> to vector<8x32xi1>
    %380 = arith.select %379, %375, %351 : vector<8x32xi1>, vector<8x32xf32>
    %c5_i32_118 = arith.constant 5 : i32
    %c8_i32_119 = arith.constant 8 : i32
    %381 = arith.muli %c5_i32_118, %c8_i32_119 : i32
    %382 = tpu.assume_multiple %381, 8 : i32
    %383 = arith.index_cast %382 : i32 to index
    %c0_120 = arith.constant 0 : index
    %384 = vector.load %arg14[%383, %c0_120] : memref<64x128xf32, #tpu.memory_space<vmem>>, vector<8x128xf32>
    %385 = arith.truncf %375 : vector<8x32xf32> to vector<8x32xbf16>
    %c0_121 = arith.constant 0 : index
    %c0_122 = arith.constant 0 : index
    %386 = vector.load %arg8[%c0_121, %c0_122] : memref<32x128xbf16, #tpu.memory_space<vmem>>, vector<32x128xbf16>
    %cst_123 = arith.constant dense<0.000000e+00> : vector<8x128xf32>
    %387 = tpu.matmul %385, %386, %cst_123 {dimension_numbers = #tpu.dot_dimension_numbers<[1], [0], [0], [1], [0, 0, 1, 1], [], []>} : vector<8x32xbf16>, vector<32x128xbf16>, vector<8x128xf32> -> vector<8x128xf32>
    %388 = arith.addf %384, %387 : vector<8x128xf32>
    %389 = vector.extract_strided_slice %388 {offsets = [0, 0], sizes = [8, 96], strides = [1, 1]} : vector<8x128xf32> to vector<8x96xf32>
    %390 = arith.negf %389 : vector<8x96xf32>
    %391 = math.exp %390 : vector<8x96xf32>
    %cst_124 = arith.constant 1.000000e+00 : f32
    %392 = vector.broadcast %cst_124 : f32 to vector<8x96xf32>
    %393 = arith.addf %392, %391 : vector<8x96xf32>
    %394 = arith.divf %392, %393 : vector<8x96xf32>
    %395 = vector.extract_strided_slice %388 {offsets = [0, 96], sizes = [8, 32], strides = [1, 1]} : vector<8x128xf32> to vector<8x32xf32>
    %396 = math.tanh %395 : vector<8x32xf32>
    %397 = vector.extract_strided_slice %394 {offsets = [0, 0], sizes = [8, 32], strides = [1, 1]} : vector<8x96xf32> to vector<8x32xf32>
    %398 = vector.extract_strided_slice %394 {offsets = [0, 32], sizes = [8, 32], strides = [1, 1]} : vector<8x96xf32> to vector<8x32xf32>
    %399 = vector.extract_strided_slice %394 {offsets = [0, 64], sizes = [8, 32], strides = [1, 1]} : vector<8x96xf32> to vector<8x32xf32>
    %400 = arith.mulf %398, %373 : vector<8x32xf32>
    %401 = arith.mulf %397, %396 : vector<8x32xf32>
    %402 = arith.addf %400, %401 : vector<8x32xf32>
    %403 = math.tanh %402 : vector<8x32xf32>
    %404 = arith.mulf %399, %403 : vector<8x32xf32>
    %405 = vector.broadcast %c5_i32_118 : i32 to vector<8x1xi32>
    %406 = arith.cmpi eq, %1, %405 : vector<8x1xi32>
    %407 = vector.shape_cast %406 : vector<8x1xi1> to vector<8x1xi1>
    %408 = vector.broadcast %407 : vector<8x1xi1> to vector<8x32xi1>
    %409 = arith.select %408, %404, %380 : vector<8x32xi1>, vector<8x32xf32>
    %c6_i32_125 = arith.constant 6 : i32
    %c8_i32_126 = arith.constant 8 : i32
    %410 = arith.muli %c6_i32_125, %c8_i32_126 : i32
    %411 = tpu.assume_multiple %410, 8 : i32
    %412 = arith.index_cast %411 : i32 to index
    %c0_127 = arith.constant 0 : index
    %413 = vector.load %arg14[%412, %c0_127] : memref<64x128xf32, #tpu.memory_space<vmem>>, vector<8x128xf32>
    %414 = arith.truncf %404 : vector<8x32xf32> to vector<8x32xbf16>
    %c0_128 = arith.constant 0 : index
    %c0_129 = arith.constant 0 : index
    %415 = vector.load %arg8[%c0_128, %c0_129] : memref<32x128xbf16, #tpu.memory_space<vmem>>, vector<32x128xbf16>
    %cst_130 = arith.constant dense<0.000000e+00> : vector<8x128xf32>
    %416 = tpu.matmul %414, %415, %cst_130 {dimension_numbers = #tpu.dot_dimension_numbers<[1], [0], [0], [1], [0, 0, 1, 1], [], []>} : vector<8x32xbf16>, vector<32x128xbf16>, vector<8x128xf32> -> vector<8x128xf32>
    %417 = arith.addf %413, %416 : vector<8x128xf32>
    %418 = vector.extract_strided_slice %417 {offsets = [0, 0], sizes = [8, 96], strides = [1, 1]} : vector<8x128xf32> to vector<8x96xf32>
    %419 = arith.negf %418 : vector<8x96xf32>
    %420 = math.exp %419 : vector<8x96xf32>
    %cst_131 = arith.constant 1.000000e+00 : f32
    %421 = vector.broadcast %cst_131 : f32 to vector<8x96xf32>
    %422 = arith.addf %421, %420 : vector<8x96xf32>
    %423 = arith.divf %421, %422 : vector<8x96xf32>
    %424 = vector.extract_strided_slice %417 {offsets = [0, 96], sizes = [8, 32], strides = [1, 1]} : vector<8x128xf32> to vector<8x32xf32>
    %425 = math.tanh %424 : vector<8x32xf32>
    %426 = vector.extract_strided_slice %423 {offsets = [0, 0], sizes = [8, 32], strides = [1, 1]} : vector<8x96xf32> to vector<8x32xf32>
    %427 = vector.extract_strided_slice %423 {offsets = [0, 32], sizes = [8, 32], strides = [1, 1]} : vector<8x96xf32> to vector<8x32xf32>
    %428 = vector.extract_strided_slice %423 {offsets = [0, 64], sizes = [8, 32], strides = [1, 1]} : vector<8x96xf32> to vector<8x32xf32>
    %429 = arith.mulf %427, %402 : vector<8x32xf32>
    %430 = arith.mulf %426, %425 : vector<8x32xf32>
    %431 = arith.addf %429, %430 : vector<8x32xf32>
    %432 = math.tanh %431 : vector<8x32xf32>
    %433 = arith.mulf %428, %432 : vector<8x32xf32>
    %434 = vector.broadcast %c6_i32_125 : i32 to vector<8x1xi32>
    %435 = arith.cmpi eq, %1, %434 : vector<8x1xi32>
    %436 = vector.shape_cast %435 : vector<8x1xi1> to vector<8x1xi1>
    %437 = vector.broadcast %436 : vector<8x1xi1> to vector<8x32xi1>
    %438 = arith.select %437, %433, %409 : vector<8x32xi1>, vector<8x32xf32>
    %c7_i32_132 = arith.constant 7 : i32
    %c8_i32_133 = arith.constant 8 : i32
    %439 = arith.muli %c7_i32_132, %c8_i32_133 : i32
    %440 = tpu.assume_multiple %439, 8 : i32
    %441 = arith.index_cast %440 : i32 to index
    %c0_134 = arith.constant 0 : index
    %442 = vector.load %arg14[%441, %c0_134] : memref<64x128xf32, #tpu.memory_space<vmem>>, vector<8x128xf32>
    %443 = arith.truncf %433 : vector<8x32xf32> to vector<8x32xbf16>
    %c0_135 = arith.constant 0 : index
    %c0_136 = arith.constant 0 : index
    %444 = vector.load %arg8[%c0_135, %c0_136] : memref<32x128xbf16, #tpu.memory_space<vmem>>, vector<32x128xbf16>
    %cst_137 = arith.constant dense<0.000000e+00> : vector<8x128xf32>
    %445 = tpu.matmul %443, %444, %cst_137 {dimension_numbers = #tpu.dot_dimension_numbers<[1], [0], [0], [1], [0, 0, 1, 1], [], []>} : vector<8x32xbf16>, vector<32x128xbf16>, vector<8x128xf32> -> vector<8x128xf32>
    %446 = arith.addf %442, %445 : vector<8x128xf32>
    %447 = vector.extract_strided_slice %446 {offsets = [0, 0], sizes = [8, 96], strides = [1, 1]} : vector<8x128xf32> to vector<8x96xf32>
    %448 = arith.negf %447 : vector<8x96xf32>
    %449 = math.exp %448 : vector<8x96xf32>
    %cst_138 = arith.constant 1.000000e+00 : f32
    %450 = vector.broadcast %cst_138 : f32 to vector<8x96xf32>
    %451 = arith.addf %450, %449 : vector<8x96xf32>
    %452 = arith.divf %450, %451 : vector<8x96xf32>
    %453 = vector.extract_strided_slice %446 {offsets = [0, 96], sizes = [8, 32], strides = [1, 1]} : vector<8x128xf32> to vector<8x32xf32>
    %454 = math.tanh %453 : vector<8x32xf32>
    %455 = vector.extract_strided_slice %452 {offsets = [0, 0], sizes = [8, 32], strides = [1, 1]} : vector<8x96xf32> to vector<8x32xf32>
    %456 = vector.extract_strided_slice %452 {offsets = [0, 32], sizes = [8, 32], strides = [1, 1]} : vector<8x96xf32> to vector<8x32xf32>
    %457 = vector.extract_strided_slice %452 {offsets = [0, 64], sizes = [8, 32], strides = [1, 1]} : vector<8x96xf32> to vector<8x32xf32>
    %458 = arith.mulf %456, %431 : vector<8x32xf32>
    %459 = arith.mulf %455, %454 : vector<8x32xf32>
    %460 = arith.addf %458, %459 : vector<8x32xf32>
    %461 = math.tanh %460 : vector<8x32xf32>
    %462 = arith.mulf %457, %461 : vector<8x32xf32>
    %463 = vector.broadcast %c7_i32_132 : i32 to vector<8x1xi32>
    %464 = arith.cmpi eq, %1, %463 : vector<8x1xi32>
    %465 = vector.shape_cast %464 : vector<8x1xi1> to vector<8x1xi1>
    %466 = vector.broadcast %465 : vector<8x1xi1> to vector<8x32xi1>
    %467 = arith.select %466, %462, %438 : vector<8x32xi1>, vector<8x32xf32>
    %c8_i32_139 = arith.constant 8 : i32
    %c0_140 = arith.constant 0 : index
    %c0_141 = arith.constant 0 : index
    %468 = vector.load %arg11[%c0_140, %c0_141] : memref<32x1xf32, #tpu.memory_space<vmem>>, vector<32x1xf32>
    %cst_142 = arith.constant dense<0.000000e+00> : vector<8x1xf32>
    %469 = tpu.matmul %467, %468, %cst_142 {dimension_numbers = #tpu.dot_dimension_numbers<[1], [0], [0], [1], [0, 0, 1, 1], [], []>} : vector<8x32xf32>, vector<32x1xf32>, vector<8x1xf32> -> vector<8x1xf32>
    %c0_143 = arith.constant 0 : index
    %c0_144 = arith.constant 0 : index
    %470 = vector.load %arg12[%c0_143, %c0_144] : memref<1x1xf32, #tpu.memory_space<vmem>>, vector<1x1xf32>
    %471 = vector.broadcast %470 : vector<1x1xf32> to vector<8x1xf32>
    %472 = arith.addf %469, %471 : vector<8x1xf32>
    %473 = arith.negf %472 : vector<8x1xf32>
    %474 = math.exp %473 : vector<8x1xf32>
    %cst_145 = arith.constant 1.000000e+00 : f32
    %475 = vector.broadcast %cst_145 : f32 to vector<8x1xf32>
    %476 = arith.addf %475, %474 : vector<8x1xf32>
    %477 = arith.divf %475, %476 : vector<8x1xf32>
    %c0_146 = arith.constant 0 : index
    %c0_147 = arith.constant 0 : index
    %478 = vector.load %arg13[%c0_146, %c0_147] : memref<8x1xf32, #tpu.memory_space<vmem>>, vector<8x1xf32>
    tpu.vector_store %arg13[%c0_146, %c0_147], %477 {strides = array<i32>} : memref<8x1xf32, #tpu.memory_space<vmem>>, vector<8x1xf32>,
    return
  }
}

</mosaic_0001>

<bundles_post_ra>
// kernel: tpu_custom_call.1
= control target key start
LH: loop header
LB: loop body
LE: loop exit
PB: predicated region body
PF: predicated region fallthrough
CT: control target
= control target key end

     0   :  { %s2348_s0 = inlined_call_operand.vmem [shape: bf16[64,4], index: 0, kind: input, shape index: {}]   ;;  %s2349_s1 = inlined_call_operand.vmem [shape: bf16[8,32], index: 1, kind: input, shape index: {}]   ;;  %s2350_s2 = inlined_call_operand.vmem [shape: s32[8,1], index: 2, kind: input, shape index: {}]   ;;  %s2351_s3 = inlined_call_operand.vmem [shape: bf16[4,128], index: 3, kind: input, shape index: {}]   ;;  %s2352_s4 = inlined_call_operand.vmem [shape: bf16[32,128], index: 4, kind: input, shape index: {}]   ;;  %s2353_s5 = inlined_call_operand.vmem [shape: f32[1,128], index: 5, kind: input, shape index: {}]   ;;  %s2354_s6 = inlined_call_operand.vmem [shape: bf16[32,64], index: 6, kind: input, shape index: {}]   ;;  %s2355_s7 = inlined_call_operand.vmem [shape: bf16[32,128], index: 7, kind: input, shape index: {}]   ;;  %s2356_s8 = inlined_call_operand.vmem [shape: bf16[32,128], index: 8, kind: input, shape index: {}]   ;;  %s2357_s9 = inlined_call_operand.vmem [shape: f32[1,128], index: 9, kind: input, shape index: {}]   ;;  %s2358_s10 = inlined_call_operand.hbm [shape: bf16[32,64], index: 10, kind: input, shape index: {}]   ;;  %s2359_s11 = inlined_call_operand.vmem [shape: f32[32,1], index: 11, kind: input, shape index: {}]   ;;  %s2360_s12 = inlined_call_operand.<no memory space> [shape: f32[1,1], index: 12, kind: input, shape index: {}]   ;;  %s2361_s13 = inlined_call_operand.vmem [shape: f32[8,1], index: 13, kind: output, shape index: {}]  }
   0x1   :  { %v18_v0 = vstv %s2360_s12 }
   0x2   :  { %19 = vst [vmem:[#allocation4] sm:$0x1] %v18_v0 }
   0x3   :  { %20 = vsyncpa [#allocation6], 0  ;;  %s45_s29 = sshll.u32 %s2358_s10, 4  ;;  %s1906_s30 = smov [#allocation5]   ;;  %s46_s29 = int_to_ptr.hbm [resolvable:$true] %s45_s29 }
   0x4   :  { %s47_s14 = sshll.u32 %s1906_s30, 4  ;;  %s1907_s15 = smov 64   ;;  %s48_s14 = int_to_ptr.vmem [resolvable:$true] %s47_s14 }
   0x5   :  { %s1908_s16 = smov 4  }
   0x6   :  { %53 = dma.hbm_to_vmem [thread:$0]  %s46_s29, 256, %s48_s14, [#allocation6], %s1907_s15, %s1907_s15, %s1908_s16  }
   0x7   :  { %1904 = dma.done.wait [#allocation6], 256  }
   0x8   :  { %1905 = vsyncadd [#allocation6], 4294967040  ;;  %v1709_v1 = vld [vmem:[%s2354_s6 + $0x8] sm:$0xff]  ;;  %v1708_v2 = vld [vmem:[%s2354_s6] sm:$0xff]  ;;  %vm168_vm0 = vcmask 261120   ;;  %vm111_vm1 = vcmask 1041408  }
   0x9   :  { %178 = vmatpush.bf16.msra.mxu1 %v1709_v1  ;;  %v1998_v3 = vld [vmem:[%s2349_s1] sm:$0xf]  ;;  %v1711_v5 = vld [vmem:[%s2352_s4 + $0x8] sm:$0xff]  ;;  %vm98_vm2 = vcmask 31744   ;;  %s1909_s28 = smov 32  }
   0xa   :  { %v73_v4 = vld [vmem:[%s2351_s3] sm:$0x3]  ;;  %213 = vmatpush.bf16.msra.mxu2 %v1711_v5  ;;  %v1713_v39 = vld [vmem:[%s2352_s4 + $0x8] sm:$0xff] }
   0xb   :  { %v113_v6 = vsel %vm111_vm1, %v73_v4, 0  ;;  %v1704_v7 = vld [vmem:[%s2348_s0] sm:$0xff]  ;;  %294 = vmatpush.bf16.msra.mxu3 %v1713_v39 }
   0xc   :  { %122 = vmatpush.bf16.msra.mxu0 %v113_v6  ;;  %v1710_v8 = vld [vmem:[%s2352_s4] sm:$0xff] }
   0xd   :  { %179 = vmatpush.bf16.msra.mxu1 %v1708_v2  ;;  %v2019_v13 = vld [vmem:[%s2353_s5] ss:$0 sm:$0xff] }
   0xe   :  { %214 = vmatpush.bf16.msra.mxu2 %v1710_v8  ;;  %v1712_v40 = vld [vmem:[%s2352_s4] sm:$0xff]  ;;  %v1705_v8 = vld [vmem:[%s2348_s0 + $0x8] sm:$0xff] }
   0xf   :  { %1564 = vmatmul.msk.bf16.vlgmr.msra.gmra.mxu0 %vm98_vm2, %v1704_v7  ;;  %295 = vmatpush.bf16.msra.mxu3 %v1712_v40  ;;  %v1715_v7 = vld [vmem:[%s2352_s4 + $0x8] sm:$0xff] }
  0x10   :  { %1576 = vmatmul.msk.bf16.vlgmr.msra.gmra.mxu1 %vm168_vm0, %v1998_v3  ;;  %v1717_v40 = vld [vmem:[%s2352_s4 + $0x8] sm:$0xff] }
  0x11   :  { %376 = vmatpush.bf16.msrb.mxu1 %v1715_v7 }
  0x12   :  { %458 = vmatpush.bf16.msrb.mxu2 %v1717_v40 }
  0x1f   :  { %1565 = vmatmul.msk.bf16.gmra.mxu0 %vm98_vm2, %v1705_v8 }
  0x8c   :  { %v124_v14 = vpop.f32.mrf.mxu0 }
  0x8d   :  { %v181_v9 = vpop.f32.mrf.mxu1  ;;  %v125_v15 = vadd.f32 %v2019_v13, %v124_v14 }
  0x8e   :  { %1743 = vtanh.f32 %v181_v9  ;;  %v1714_v9 = vld [vmem:[%s2352_s4] sm:$0xff] }
  0x8f   :  { %377 = vmatpush.bf16.msrb.mxu1 %v1714_v9  ;;  %v1719_v9 = vld [vmem:[%s2352_s4 + $0x8] sm:$0xff] }
  0x90   :  { %540 = vmatpush.bf16.msrb.mxu3 %v1719_v9 }
  0x94   :  { %v1744_v10 = vpop.eup %1743  ;;  %v126_v45 = vpop.f32.mrf.mxu0 }
  0x95   :  { %v183_v11 = vpop.f32.mrf.mxu1  ;;  %v187_v12 = vpack.c.bf16 %v1744_v10, %v1744_v10  ;;  %v127_v46 = vadd.f32 %v2019_v13, %v126_v45 }
  0x97   :  { %1585 = vmatmul.msk.bf16.vlgmr.msra.gmra.mxu2 %vm168_vm0, %v187_v12 }
 0x11a   :  { %v216_v16 = vpop.f32.mrf.mxu2 }
 0x11b   :  { %v220_v17 = vadd.f32 %v216_v16, %v125_v15  ;;  %v129_v15 = vpop.f32.mrf.mxu0 }
 0x11c   :  { %v130_v16 = vadd.f32 %v2019_v13, %v129_v15 }
 0x11d   :  { %1745 = vtanh.f32 %v220_v17  ;;  %v1586_v20 = vmul.f32 -1.442695, %v220_v17 }
 0x11f   :  { %1747 = vpow2.f32 %v1586_v20 }
 0x122   :  { %v218_v18 = vpop.f32.mrf.mxu2 }
 0x123   :  { %v1746_v19 = vpop.eup %1745 }
 0x124   :  { %243 = vrot.lane.b32.xlu0 %v1746_v19, %s1909_s28 }
 0x125   :  { %v1748_v21 = vpop.eup %1747 }
 0x126   :  { %v224_v22 = vadd.f32 1.0, %v1748_v21 }
 0x128   :  { %1749 = vrcp.f32 %v224_v22  ;;  %v236_v28 = vand.u32 2147483648, %v224_v22  ;;  %vm230_vm4 = vweird.f32 %v224_v22  ;;  %v234_v29 = vand.u32 2147483647, %v224_v22 }
 0x12a   :  { %v237_v31 = vor.u32 1.1754944e-38, %v236_v28  ;;  %vm235_vm6 = vcmp.eq.f32.partialorder %v234_v29, 8.507059e+37 }
 0x12e   :  { %v1750_v23 = vpop.eup %1749 }
 0x12f   :  { %v226_v24 = vmul.f32 %v1750_v23, %v224_v22  ;;  %vm231_vm3 = vweird.f32 %v1750_v23 }
 0x130   :  { %vm232_vm5 = vmor %vm230_vm4, %vm231_vm3 }
 0x131   :  { %v227_v25 = vsub.f32 1.0, %v226_v24 }
 0x133   :  { %v228_v26 = vmul.f32 %v1750_v23, %v227_v25 }
 0x135   :  { %v229_v27 = vadd.f32 %v1750_v23, %v228_v26 }
 0x137   :  { %v233_v30 = vsel %vm232_vm5, %v1750_v23, %v229_v27 }
 0x138   :  { %v238_v33 = vsel %vm235_vm6, %v237_v31, %v233_v30 }
 0x139   :  { %v241_v35 = vmul.f32 %v1744_v10, %v238_v33 }
 0x196   :  { %v244_v32 = vpop.permute.xlu0 %243 }
 0x197   :  { %v246_v34 = vmul.f32 %v244_v32, %v238_v33 }
 0x199   :  { %248 = vrot.lane.b32.xlu0 %v246_v34, %s1909_s28 }
 0x20b   :  { %v249_v36 = vpop.permute.xlu0 %248 }
 0x20c   :  { %v251_v37 = vadd.f32 %v249_v36, %v241_v35 }
 0x20e   :  { %1751 = vtanh.f32 %v251_v37 }
 0x214   :  { %v1752_v38 = vpop.eup %1751 }
 0x215   :  { %254 = vrot.lane.b32.xlu1 %v1752_v38, %s1909_s28 }
 0x287   :  { %v255_v41 = vpop.permute.xlu1 %254 }
 0x288   :  { %v2031_v42 = vmul.f32 %v255_v41, %v238_v33  ;;  %v1716_v41 = vld [vmem:[%s2352_s4] sm:$0xff] }
 0x289   :  { %459 = vmatpush.bf16.msrb.mxu2 %v1716_v41 }
 0x28a   :  { %v265_v43 = vpack.c.bf16 %v2031_v42, %v2031_v42 }
 0x28c   :  { %271 = vrot.lane.b32.xlu1 %v265_v43, %s1907_s15 }
 0x2fe   :  { %v272_v44 = vpop.permute.xlu1 %271 }
 0x2ff   :  { %1595 = vmatmul.msk.bf16.vlgmr.msra.gmra.mxu3 %vm168_vm0, %v272_v44 }
 0x382   :  { %v297_v47 = vpop.f32.mrf.mxu3 }
 0x383   :  { %v301_v48 = vadd.f32 %v297_v47, %v127_v46  ;;  %v131_v47 = vpop.f32.mrf.mxu0 }
 0x385   :  { %1753 = vtanh.f32 %v301_v48  ;;  %v1596_v51 = vmul.f32 -1.442695, %v301_v48  ;;  %v132_v48 = vadd.f32 %v2019_v13, %v131_v47 }
 0x387   :  { %1755 = vpow2.f32 %v1596_v51 }
 0x38a   :  { %v299_v49 = vpop.f32.mrf.mxu3 }
 0x38b   :  { %v1754_v50 = vpop.eup %1753 }
 0x38c   :  { %324 = vrot.lane.b32.xlu2 %v1754_v50, %s1909_s28 }
 0x38d   :  { %v1756_v52 = vpop.eup %1755 }
 0x38e   :  { %v305_v53 = vadd.f32 1.0, %v1756_v52 }
 0x390   :  { %1757 = vrcp.f32 %v305_v53  ;;  %v317_v59 = vand.u32 2147483648, %v305_v53  ;;  %vm311_vm8 = vweird.f32 %v305_v53  ;;  %v315_v60 = vand.u32 2147483647, %v305_v53 }
 0x392   :  { %v318_v62 = vor.u32 1.1754944e-38, %v317_v59  ;;  %vm316_vm10 = vcmp.eq.f32.partialorder %v315_v60, 8.507059e+37 }
 0x396   :  { %v1758_v54 = vpop.eup %1757 }
 0x397   :  { %v307_v55 = vmul.f32 %v1758_v54, %v305_v53  ;;  %vm312_vm7 = vweird.f32 %v1758_v54 }
 0x398   :  { %vm313_vm9 = vmor %vm311_vm8, %vm312_vm7 }
 0x399   :  { %v308_v56 = vsub.f32 1.0, %v307_v55 }
 0x39b   :  { %v309_v57 = vmul.f32 %v1758_v54, %v308_v56 }
 0x39d   :  { %v310_v58 = vadd.f32 %v1758_v54, %v309_v57 }
 0x39f   :  { %v314_v61 = vsel %vm313_vm9, %v1758_v54, %v310_v58 }
 0x3a0   :  { %v319_v0 = vsel %vm316_vm10, %v318_v62, %v314_v61 }
 0x3a1   :  { %v322_v2 = vmul.f32 %v319_v0, %v251_v37 }
 0x3e6   :  { %v325_v63 = vpop.permute.xlu2 %324 }
 0x3e7   :  { %v327_v1 = vmul.f32 %v325_v63, %v319_v0 }
 0x3e9   :  { %329 = vrot.lane.b32.xlu2 %v327_v1, %s1909_s28 }
 0x443   :  { %v330_v4 = vpop.permute.xlu2 %329 }
 0x444   :  { %v332_v5 = vadd.f32 %v330_v4, %v322_v2 }
 0x446   :  { %1759 = vtanh.f32 %v332_v5 }
 0x44c   :  { %v1760_v6 = vpop.eup %1759 }
 0x44d   :  { %335 = vrot.lane.b32.xlu0 %v1760_v6, %s1909_s28 }
 0x4bf   :  { %v336_v10 = vpop.permute.xlu0 %335 }
 0x4c0   :  { %v2051_v11 = vmul.f32 %v336_v10, %v319_v0  ;;  %v1706_v10 = vld [vmem:[%s2348_s0 + $0x10] sm:$0xff] }
 0x4c1   :  { %1566 = vmatmul.msk.bf16.gmra.mxu0 %vm98_vm2, %v1706_v10 }
 0x4c2   :  { %v347_v12 = vpack.c.bf16 %v2051_v11, %v2051_v11 }
 0x4c4   :  { %353 = vrot.lane.b32.xlu1 %v347_v12, %s1907_s15  ;;  %v1718_v12 = vld [vmem:[%s2352_s4] sm:$0xff] }
 0x4c5   :  { %541 = vmatpush.bf16.msrb.mxu3 %v1718_v12 }
 0x536   :  { %v354_v14 = vpop.permute.xlu1 %353 }
 0x537   :  { %1605 = vmatmul.msk.bf16.vlgmr.msrb.gmra.mxu1 %vm168_vm0, %v354_v14 }
 0x5b4   :  { %v379_v17 = vpop.f32.mrf.mxu1 }
 0x5b5   :  { %v383_v18 = vadd.f32 %v379_v17, %v130_v16 }
 0x5b7   :  { %1761 = vtanh.f32 %v383_v18  ;;  %v1606_v21 = vmul.f32 -1.442695, %v383_v18  ;;  %v134_v18 = vpop.f32.mrf.mxu0 }
 0x5b9   :  { %1763 = vpow2.f32 %v1606_v21 }
 0x5bc   :  { %v381_v19 = vpop.f32.mrf.mxu1 }
 0x5bd   :  { %v1762_v20 = vpop.eup %1761  ;;  %v135_v19 = vadd.f32 %v2019_v13, %v134_v18  ;;  %v1722_v18 = vld [vmem:[%s2352_s4] sm:$0xff] }
 0x5be   :  { %406 = vrot.lane.b32.xlu2 %v1762_v20, %s1909_s28 }
 0x5bf   :  { %v1764_v22 = vpop.eup %1763 }
 0x5c0   :  { %v387_v23 = vadd.f32 1.0, %v1764_v22 }
 0x5c2   :  { %1765 = vrcp.f32 %v387_v23  ;;  %v399_v29 = vand.u32 2147483648, %v387_v23  ;;  %vm393_vm12 = vweird.f32 %v387_v23  ;;  %v397_v30 = vand.u32 2147483647, %v387_v23 }
 0x5c4   :  { %v400_v32 = vor.u32 1.1754944e-38, %v399_v29  ;;  %vm398_vm14 = vcmp.eq.f32.partialorder %v397_v30, 8.507059e+37 }
 0x5c8   :  { %v1766_v24 = vpop.eup %1765 }
 0x5c9   :  { %v389_v25 = vmul.f32 %v1766_v24, %v387_v23  ;;  %vm394_vm11 = vweird.f32 %v1766_v24 }
 0x5ca   :  { %vm395_vm13 = vmor %vm393_vm12, %vm394_vm11 }
 0x5cb   :  { %v390_v26 = vsub.f32 1.0, %v389_v25 }
 0x5cd   :  { %v391_v27 = vmul.f32 %v1766_v24, %v390_v26 }
 0x5cf   :  { %v392_v28 = vadd.f32 %v1766_v24, %v391_v27 }
 0x5d1   :  { %v396_v31 = vsel %vm395_vm13, %v1766_v24, %v392_v28 }
 0x5d2   :  { %v401_v34 = vsel %vm398_vm14, %v400_v32, %v396_v31 }
 0x5d3   :  { %v404_v36 = vmul.f32 %v401_v34, %v332_v5 }
 0x618   :  { %v407_v33 = vpop.permute.xlu2 %406 }
 0x619   :  { %v409_v35 = vmul.f32 %v407_v33, %v401_v34 }
 0x61b   :  { %411 = vrot.lane.b32.xlu0 %v409_v35, %s1909_s28 }
 0x68d   :  { %v412_v37 = vpop.permute.xlu0 %411 }
 0x68e   :  { %v414_v38 = vadd.f32 %v412_v37, %v404_v36 }
 0x690   :  { %1767 = vtanh.f32 %v414_v38 }
 0x696   :  { %v1768_v39 = vpop.eup %1767 }
 0x697   :  { %417 = vrot.lane.b32.xlu1 %v1768_v39, %s1909_s28 }
 0x709   :  { %v418_v43 = vpop.permute.xlu1 %417 }
 0x70a   :  { %v2067_v44 = vmul.f32 %v418_v43, %v401_v34 }
 0x70c   :  { %v429_v45 = vpack.c.bf16 %v2067_v44, %v2067_v44 }
 0x70e   :  { %435 = vrot.lane.b32.xlu2 %v429_v45, %s1907_s15  ;;  %v1721_v45 = vld [vmem:[%s2352_s4 + $0x8] sm:$0xff] }
 0x70f   :  { %622 = vmatpush.bf16.msra.mxu1 %v1721_v45  ;;  %v1729_v45 = vld [vmem:[#allocation5 + $0x8] sm:$0xff] }
 0x768   :  { %v436_v46 = vpop.permute.xlu2 %435 }
 0x769   :  { %1615 = vmatmul.msk.bf16.vlgmr.msrb.gmra.mxu2 %vm168_vm0, %v436_v46  ;;  %v1720_v46 = vld [vmem:[%s2352_s4] sm:$0xff] }
 0x76a   :  { %623 = vmatpush.bf16.msra.mxu1 %v1720_v46  ;;  %v1728_v46 = vld [vmem:[#allocation5] sm:$0xff] }
 0x7ec   :  { %v461_v49 = vpop.f32.mrf.mxu2 }
 0x7ed   :  { %v465_v50 = vadd.f32 %v461_v49, %v132_v48 }
 0x7ef   :  { %1769 = vtanh.f32 %v465_v50  ;;  %v1616_v53 = vmul.f32 -1.442695, %v465_v50 }
 0x7f1   :  { %1771 = vpow2.f32 %v1616_v53 }
 0x7f4   :  { %v463_v51 = vpop.f32.mrf.mxu2 }
 0x7f5   :  { %v1770_v52 = vpop.eup %1769  ;;  %v136_v51 = vpop.f32.mrf.mxu0 }
 0x7f6   :  { %488 = vrot.lane.b32.xlu0 %v1770_v52, %s1909_s28  ;;  %v137_v52 = vadd.f32 %v2019_v13, %v136_v51 }
 0x7f7   :  { %v1772_v54 = vpop.eup %1771 }
 0x7f8   :  { %v469_v55 = vadd.f32 1.0, %v1772_v54 }
 0x7fa   :  { %1773 = vrcp.f32 %v469_v55  ;;  %v481_v61 = vand.u32 2147483648, %v469_v55  ;;  %vm475_vm1 = vweird.f32 %v469_v55  ;;  %v479_v62 = vand.u32 2147483647, %v469_v55 }
 0x7fc   :  { %v482_v0 = vor.u32 1.1754944e-38, %v481_v61  ;;  %vm480_vm4 = vcmp.eq.f32.partialorder %v479_v62, 8.507059e+37 }
 0x800   :  { %v1774_v56 = vpop.eup %1773 }
 0x801   :  { %v471_v57 = vmul.f32 %v1774_v56, %v469_v55  ;;  %vm476_vm15 = vweird.f32 %v1774_v56 }
 0x802   :  { %vm477_vm3 = vmor %vm475_vm1, %vm476_vm15 }
 0x803   :  { %v472_v58 = vsub.f32 1.0, %v471_v57 }
 0x805   :  { %v473_v59 = vmul.f32 %v1774_v56, %v472_v58 }
 0x807   :  { %v474_v60 = vadd.f32 %v1774_v56, %v473_v59 }
 0x809   :  { %v478_v63 = vsel %vm477_vm3, %v1774_v56, %v474_v60 }
 0x80a   :  { %v483_v2 = vsel %vm480_vm4, %v482_v0, %v478_v63 }
 0x80b   :  { %v486_v5 = vmul.f32 %v483_v2, %v414_v38 }
 0x868   :  { %v489_v1 = vpop.permute.xlu0 %488 }
 0x869   :  { %v491_v4 = vmul.f32 %v489_v1, %v483_v2 }
 0x86b   :  { %493 = vrot.lane.b32.xlu1 %v491_v4, %s1909_s28 }
 0x8dd   :  { %v494_v6 = vpop.permute.xlu1 %493 }
 0x8de   :  { %v496_v7 = vadd.f32 %v494_v6, %v486_v5 }
 0x8e0   :  { %1775 = vtanh.f32 %v496_v7 }
 0x8e6   :  { %v1776_v8 = vpop.eup %1775 }
 0x8e7   :  { %499 = vrot.lane.b32.xlu2 %v1776_v8, %s1909_s28 }
 0x941   :  { %v500_v14 = vpop.permute.xlu2 %499 }
 0x942   :  { %v2087_v15 = vmul.f32 %v500_v14, %v483_v2 }
 0x944   :  { %v511_v16 = vpack.c.bf16 %v2087_v15, %v2087_v15 }
 0x946   :  { %517 = vrot.lane.b32.xlu0 %v511_v16, %s1907_s15  ;;  %v1723_v16 = vld [vmem:[%s2352_s4 + $0x8] sm:$0xff] }
 0x947   :  { %704 = vmatpush.bf16.msra.mxu2 %v1723_v16 }
 0x94b   :  { %705 = vmatpush.bf16.msra.mxu2 %v1722_v18 }
 0x94f   :  { %940 = vmatpush.bf16.msrb.mxu2 %v1729_v45 }
 0x953   :  { %941 = vmatpush.bf16.msrb.mxu2 %v1728_v46 }
 0x9b8   :  { %v518_v17 = vpop.permute.xlu0 %517 }
 0x9b9   :  { %1625 = vmatmul.msk.bf16.vlgmr.msrb.gmra.mxu3 %vm168_vm0, %v518_v17  ;;  %v1707_v17 = vld [vmem:[%s2348_s0 + $0x18] sm:$0xff] }
 0x9ba   :  { %1567 = vmatmul.msk.bf16.gmra.mxu0 %vm98_vm2, %v1707_v17 }
 0xa3c   :  { %v543_v20 = vpop.f32.mrf.mxu3 }
 0xa3d   :  { %v547_v21 = vadd.f32 %v543_v20, %v135_v19 }
 0xa3f   :  { %1777 = vtanh.f32 %v547_v21  ;;  %v1626_v24 = vmul.f32 -1.442695, %v547_v21 }
 0xa41   :  { %1779 = vpow2.f32 %v1626_v24 }
 0xa44   :  { %v545_v22 = vpop.f32.mrf.mxu3 }
 0xa45   :  { %v1778_v23 = vpop.eup %1777 }
 0xa46   :  { %570 = vrot.lane.b32.xlu1 %v1778_v23, %s1909_s28  ;;  %v139_v23 = vpop.f32.mrf.mxu0 }
 0xa47   :  { %v1780_v25 = vpop.eup %1779  ;;  %v140_v24 = vadd.f32 %v2019_v13, %v139_v23 }
 0xa48   :  { %v551_v26 = vadd.f32 1.0, %v1780_v25 }
 0xa4a   :  { %1781 = vrcp.f32 %v551_v26  ;;  %v563_v32 = vand.u32 2147483648, %v551_v26  ;;  %vm557_vm6 = vweird.f32 %v551_v26  ;;  %v561_v33 = vand.u32 2147483647, %v551_v26 }
 0xa4c   :  { %v564_v35 = vor.u32 1.1754944e-38, %v563_v32  ;;  %vm562_vm8 = vcmp.eq.f32.partialorder %v561_v33, 8.507059e+37 }
 0xa50   :  { %v1782_v27 = vpop.eup %1781 }
 0xa51   :  { %v553_v28 = vmul.f32 %v1782_v27, %v551_v26  ;;  %vm558_vm5 = vweird.f32 %v1782_v27 }
 0xa52   :  { %vm559_vm7 = vmor %vm557_vm6, %vm558_vm5 }
 0xa53   :  { %v554_v29 = vsub.f32 1.0, %v553_v28 }
 0xa55   :  { %v555_v30 = vmul.f32 %v1782_v27, %v554_v29 }
 0xa57   :  { %v556_v31 = vadd.f32 %v1782_v27, %v555_v30 }
 0xa59   :  { %v560_v34 = vsel %vm559_vm7, %v1782_v27, %v556_v31 }
 0xa5a   :  { %v565_v37 = vsel %vm562_vm8, %v564_v35, %v560_v34 }
 0xa5b   :  { %v568_v39 = vmul.f32 %v565_v37, %v496_v7 }
 0xab8   :  { %v571_v36 = vpop.permute.xlu1 %570 }
 0xab9   :  { %v573_v38 = vmul.f32 %v571_v36, %v565_v37 }
 0xabb   :  { %575 = vrot.lane.b32.xlu2 %v573_v38, %s1909_s28 }
 0xb15   :  { %v576_v40 = vpop.permute.xlu2 %575 }
 0xb16   :  { %v578_v41 = vadd.f32 %v576_v40, %v568_v39 }
 0xb18   :  { %1783 = vtanh.f32 %v578_v41 }
 0xb1e   :  { %v1784_v43 = vpop.eup %1783 }
 0xb1f   :  { %581 = vrot.lane.b32.xlu0 %v1784_v43, %s1909_s28 }
 0xb91   :  { %v582_v47 = vpop.permute.xlu0 %581 }
 0xb92   :  { %v2103_v48 = vmul.f32 %v582_v47, %v565_v37 }
 0xb94   :  { %v593_v49 = vpack.c.bf16 %v2103_v48, %v2103_v48 }
 0xb96   :  { %599 = vrot.lane.b32.xlu1 %v593_v49, %s1907_s15 }
 0xc08   :  { %v600_v50 = vpop.permute.xlu1 %599 }
 0xc09   :  { %1635 = vmatmul.msk.bf16.vlgmr.msra.gmra.mxu1 %vm168_vm0, %v600_v50 }
 0xc86   :  { %v625_v53 = vpop.f32.mrf.mxu1 }
 0xc87   :  { %v629_v54 = vadd.f32 %v625_v53, %v137_v52  ;;  %v1725_v53 = vld [vmem:[%s2352_s4 + $0x8] sm:$0xff] }
 0xc88   :  { %786 = vmatpush.bf16.msra.mxu3 %v1725_v53 }
 0xc89   :  { %1785 = vtanh.f32 %v629_v54  ;;  %v1636_v57 = vmul.f32 -1.442695, %v629_v54  ;;  %v1724_v54 = vld [vmem:[%s2352_s4] sm:$0xff] }
 0xc8b   :  { %1787 = vpow2.f32 %v1636_v57 }
 0xc8c   :  { %787 = vmatpush.bf16.msra.mxu3 %v1724_v54 }
 0xc8e   :  { %v627_v55 = vpop.f32.mrf.mxu1 }
 0xc8f   :  { %v1786_v56 = vpop.eup %1785 }
 0xc90   :  { %652 = vrot.lane.b32.xlu2 %v1786_v56, %s1909_s28 }
 0xc91   :  { %v1788_v58 = vpop.eup %1787 }
 0xc92   :  { %v633_v59 = vadd.f32 1.0, %v1788_v58 }
 0xc94   :  { %1789 = vrcp.f32 %v633_v59  ;;  %v645_v1 = vand.u32 2147483648, %v633_v59  ;;  %vm639_vm10 = vweird.f32 %v633_v59  ;;  %v643_v2 = vand.u32 2147483647, %v633_v59 }
 0xc96   :  { %v646_v5 = vor.u32 1.1754944e-38, %v645_v1  ;;  %vm644_vm12 = vcmp.eq.f32.partialorder %v643_v2, 8.507059e+37 }
 0xc9a   :  { %v1790_v60 = vpop.eup %1789 }
 0xc9b   :  { %v635_v61 = vmul.f32 %v1790_v60, %v633_v59  ;;  %vm640_vm9 = vweird.f32 %v1790_v60 }
 0xc9c   :  { %vm641_vm11 = vmor %vm639_vm10, %vm640_vm9 }
 0xc9d   :  { %v636_v62 = vsub.f32 1.0, %v635_v61 }
 0xc9f   :  { %v637_v63 = vmul.f32 %v1790_v60, %v636_v62 }
 0xca1   :  { %v638_v0 = vadd.f32 %v1790_v60, %v637_v63  ;;  %v2165_v63 = vld [vmem:[%s2356_s8 + $0x8] sm:$0xff] }
 0xca2   :  { %975 = vmatpush.bf16.msrb.mxu3 %v2165_v63  ;;  %1041 = vmatpush.bf16.msrb.mxu0 %v2165_v63 }
 0xca3   :  { %v642_v4 = vsel %vm641_vm11, %v1790_v60, %v638_v0  ;;  %v2171_v0 = vld [vmem:[%s2356_s8] sm:$0xff] }
 0xca4   :  { %v647_v7 = vsel %vm644_vm12, %v646_v5, %v642_v4 }
 0xca5   :  { %v650_v9 = vmul.f32 %v647_v7, %v578_v41 }
 0xca6   :  { %976 = vmatpush.bf16.msrb.mxu3 %v2171_v0  ;;  %1042 = vmatpush.bf16.msrb.mxu0 %v2171_v0 }
 0xcaa   :  { %1239 = vmatpush.bf16.msra.mxu0 %v2165_v63 }
 0xcae   :  { %1240 = vmatpush.bf16.msra.mxu0 %v2171_v0 }
 0xcea   :  { %v653_v6 = vpop.permute.xlu2 %652 }
 0xceb   :  { %v655_v8 = vmul.f32 %v653_v6, %v647_v7 }
 0xced   :  { %657 = vrot.lane.b32.xlu0 %v655_v8, %s1909_s28 }
 0xd5f   :  { %v658_v10 = vpop.permute.xlu0 %657 }
 0xd60   :  { %v660_v12 = vadd.f32 %v658_v10, %v650_v9 }
 0xd62   :  { %1791 = vtanh.f32 %v660_v12 }
 0xd68   :  { %v1792_v14 = vpop.eup %1791 }
 0xd69   :  { %663 = vrot.lane.b32.xlu1 %v1792_v14, %s1909_s28 }
 0xddb   :  { %v664_v19 = vpop.permute.xlu1 %663 }
 0xddc   :  { %v2123_v20 = vmul.f32 %v664_v19, %v647_v7  ;;  %v2193_v7 = vld [vmem:[%s2357_s9] ss:$0 sm:$0xff] }
 0xdde   :  { %v675_v21 = vpack.c.bf16 %v2123_v20, %v2123_v20 }
 0xde0   :  { %681 = vrot.lane.b32.xlu2 %v675_v21, %s1907_s15 }
 0xe3a   :  { %v682_v22 = vpop.permute.xlu2 %681 }
 0xe3b   :  { %1645 = vmatmul.msk.bf16.vlgmr.msra.gmra.mxu2 %vm168_vm0, %v682_v22 }
 0xe3c   :  { %1107 = vmatpush.bf16.msra.mxu2 %v2165_v63 }
 0xe40   :  { %1108 = vmatpush.bf16.msra.mxu2 %v2171_v0 }
 0xe4b   :  { %1677 = vmatmul.msk.bf16.vlgmr.msrb.gmra.mxu2 %vm168_vm0, %v1998_v3  ;;  %v1726_v3 = vld [vmem:[%s2355_s7] sm:$0xff] }
 0xe4c   :  { %1305 = vmatpush.bf16.msrb.mxu2 %v2165_v63 }
 0xe50   :  { %1306 = vmatpush.bf16.msrb.mxu2 %v2171_v0 }
 0xebe   :  { %v707_v25 = vpop.f32.mrf.mxu2 }
 0xebf   :  { %v711_v26 = vadd.f32 %v707_v25, %v140_v24 }
 0xec1   :  { %1793 = vtanh.f32 %v711_v26  ;;  %v1646_v29 = vmul.f32 -1.442695, %v711_v26 }
 0xec3   :  { %1795 = vpow2.f32 %v1646_v29 }
 0xec6   :  { %v709_v27 = vpop.f32.mrf.mxu2 }
 0xec7   :  { %v1794_v28 = vpop.eup %1793 }
 0xec8   :  { %734 = vrot.lane.b32.xlu0 %v1794_v28, %s1909_s28 }
 0xec9   :  { %v1796_v30 = vpop.eup %1795 }
 0xeca   :  { %v715_v31 = vadd.f32 1.0, %v1796_v30 }
 0xecc   :  { %1797 = vrcp.f32 %v715_v31  ;;  %v727_v37 = vand.u32 2147483648, %v715_v31  ;;  %vm721_vm13 = vweird.f32 %v715_v31  ;;  %v725_v13 = vand.u32 2147483647, %v715_v31 }
 0xece   :  { %v728_v39 = vor.u32 1.1754944e-38, %v727_v37  ;;  %vm726_vm15 = vcmp.eq.f32.partialorder %v725_v13, 8.507059e+37  ;;  %v943_v61 = vpop.f32.mrf.mxu2 }
 0xed2   :  { %v1798_v32 = vpop.eup %1797 }
 0xed3   :  { %v717_v33 = vmul.f32 %v1798_v32, %v715_v31  ;;  %vm722_vm2 = vweird.f32 %v1798_v32 }
 0xed4   :  { %vm723_vm14 = vmor %vm721_vm13, %vm722_vm2 }
 0xed5   :  { %v718_v34 = vsub.f32 1.0, %v717_v33 }
 0xed6   :  { %v945_v62 = vpop.f32.mrf.mxu2 }
 0xed7   :  { %v719_v35 = vmul.f32 %v1798_v32, %v718_v34 }
 0xed9   :  { %v720_v36 = vadd.f32 %v1798_v32, %v719_v35 }
 0xedb   :  { %v724_v38 = vsel %vm723_vm14, %v1798_v32, %v720_v36 }
 0xedc   :  { %v729_v41 = vsel %vm726_vm15, %v728_v39, %v724_v38 }
 0xedd   :  { %v732_v47 = vmul.f32 %v729_v41, %v660_v12 }
 0xf3a   :  { %v735_v40 = vpop.permute.xlu0 %734 }
 0xf3b   :  { %v737_v43 = vmul.f32 %v735_v40, %v729_v41  ;;  %v2207_v40 = vpop.f32.mrf.mxu0 }
 0xf3d   :  { %739 = vrot.lane.b32.xlu1 %v737_v43, %s1909_s28 }
 0xf45   :  { %259 = vrot.lane.b32.xlu1 %v2031_v42, %s1907_s15  ;;  %v1727_v42 = vld [vmem:[%s2355_s7 + $0x8] sm:$0xff] }
 0xf46   :  { %887 = vmatpush.bf16.msrb.mxu1 %v1727_v42 }
 0xf4a   :  { %888 = vmatpush.bf16.msrb.mxu1 %v1726_v3 }
 0xfaf   :  { %v740_v49 = vpop.permute.xlu1 %739 }
 0xfb0   :  { %v2136_v50 = vadd.f32 %v740_v49, %v732_v47 }
 0xfb2   :  { %1799 = vtanh.f32 %v2136_v50 }
 0xfb3   :  { %1801 = vtanh.f32 %v943_v61 }
 0xfb7   :  { %v260_v51 = vpop.permute.xlu1 %259 }
 0xfb8   :  { %v1800_v52 = vpop.eup %1799  ;;  %262 = vst.msk [vmem:[#allocation3] sm:$0xff] %vm168_vm0, %v260_v51 }
 0xfb9   :  { %745 = vrot.lane.b32.xlu2 %v1800_v52, %s1909_s28  ;;  %v1802_v2 = vpop.eup %1801 }
 0xfba   :  { %v949_v4 = vpack.c.bf16 %v1802_v2, %v1802_v2 }
 0xfbf   :  { %v837_v58 = vld [vmem:[#allocation3] sm:$0xff] }
 0xfc1   :  { %340 = vrot.lane.b32.xlu2 %v2051_v11, %s1907_s15 }
0x1013   :  { %v746_v11 = vpop.permute.xlu2 %745 }
0x1014   :  { %v2155_v55 = vmul.f32 %v746_v11, %v729_v41 }
0x1016   :  { %v757_v56 = vpack.c.bf16 %v2155_v55, %v2155_v55 }
0x1018   :  { %763 = vrot.lane.b32.xlu0 %v757_v56, %s1907_s15 }
0x101b   :  { %v341_v57 = vpop.permute.xlu2 %340 }
0x101c   :  { %344 = vst.msk [vmem:[#allocation3 + $0x8] sm:$0xff] %vm168_vm0, %v341_v57 }
0x1023   :  { %v838_v59 = vld [vmem:[#allocation3 + $0x8] sm:$0xff] }
0x1024   :  { %v845_v60 = vpack.c.bf16 %v838_v59, %v837_v58 }
0x1026   :  { %1665 = vmatmul.msk.bf16.vlgmr.msrb.gmra.mxu1 %vm168_vm0, %v845_v60 }
0x108a   :  { %v764_v1 = vpop.permute.xlu0 %763 }
0x108b   :  { %1655 = vmatmul.msk.bf16.vlgmr.msra.gmra.mxu3 %vm168_vm0, %v764_v1 }
0x108c   :  { %1173 = vmatpush.bf16.msra.mxu3 %v2165_v63 }
0x1090   :  { %1174 = vmatpush.bf16.msra.mxu3 %v2171_v0 }
0x109b   :  { %1686 = vmatmul.msk.bf16.vlgmr.msrb.gmra.mxu3 %vm168_vm0, %v949_v4 }
0x109c   :  { %1371 = vmatpush.bf16.msrb.mxu3 %v2165_v63 }
0x10a0   :  { %1372 = vmatpush.bf16.msrb.mxu3 %v2171_v0 }
0x10a3   :  { %v890_v8 = vpop.f32.mrf.mxu1 }
0x10a4   :  { %v891_v9 = vadd.f32 %v2193_v7, %v890_v8 }
0x10ab   :  { %v892_v41 = vpop.f32.mrf.mxu1 }
0x10ac   :  { %v893_v43 = vadd.f32 %v2193_v7, %v892_v41 }
0x110e   :  { %v2188_v5 = vpop.f32.mrf.mxu3 }
0x1116   :  { %v791_v6 = vpop.f32.mrf.mxu3 }
0x111e   :  { %v978_v10 = vpop.f32.mrf.mxu3 }
0x111f   :  { %v982_v12 = vadd.f32 %v978_v10, %v891_v9 }
0x1121   :  { %1803 = vtanh.f32 %v982_v12  ;;  %v1687_v17 = vmul.f32 -1.442695, %v982_v12 }
0x1123   :  { %1805 = vpow2.f32 %v1687_v17 }
0x1126   :  { %v980_v14 = vpop.f32.mrf.mxu3 }
0x1127   :  { %v1804_v16 = vpop.eup %1803 }
0x1128   :  { %1005 = vrot.lane.b32.xlu0 %v1804_v16, %s1909_s28 }
0x1129   :  { %v1806_v18 = vpop.eup %1805 }
0x112a   :  { %v986_v19 = vadd.f32 1.0, %v1806_v18 }
0x112c   :  { %1807 = vrcp.f32 %v986_v19  ;;  %v998_v26 = vand.u32 2147483648, %v986_v19  ;;  %vm992_vm3 = vweird.f32 %v986_v19  ;;  %v996_v27 = vand.u32 2147483647, %v986_v19 }
0x112e   :  { %v999_v29 = vor.u32 1.1754944e-38, %v998_v26  ;;  %vm997_vm5 = vcmp.eq.f32.partialorder %v996_v27, 8.507059e+37 }
0x1132   :  { %v1808_v21 = vpop.eup %1807 }
0x1133   :  { %v988_v22 = vmul.f32 %v1808_v21, %v986_v19  ;;  %vm993_vm1 = vweird.f32 %v1808_v21 }
0x1134   :  { %vm994_vm4 = vmor %vm992_vm3, %vm993_vm1 }
0x1135   :  { %v989_v23 = vsub.f32 1.0, %v988_v22 }
0x1137   :  { %v990_v24 = vmul.f32 %v1808_v21, %v989_v23 }
0x1139   :  { %v991_v25 = vadd.f32 %v1808_v21, %v990_v24 }
0x113b   :  { %v995_v28 = vsel %vm994_vm4, %v1808_v21, %v991_v25 }
0x113c   :  { %v1000_v31 = vsel %vm997_vm5, %v999_v29, %v995_v28 }
0x113d   :  { %v1003_v33 = vmul.f32 %v1802_v2, %v1000_v31 }
0x119a   :  { %v1006_v30 = vpop.permute.xlu0 %1005 }
0x119b   :  { %v1008_v32 = vmul.f32 %v1006_v30, %v1000_v31 }
0x119d   :  { %1010 = vrot.lane.b32.xlu1 %v1008_v32, %s1909_s28 }
0x120f   :  { %v1011_v34 = vpop.permute.xlu1 %1010 }
0x1210   :  { %v1013_v35 = vadd.f32 %v1011_v34, %v1003_v33 }
0x1212   :  { %1809 = vtanh.f32 %v1013_v35 }
0x1218   :  { %v1810_v36 = vpop.eup %1809 }
0x1219   :  { %1016 = vrot.lane.b32.xlu2 %v1810_v36, %s1909_s28 }
0x1273   :  { %v1017_v37 = vpop.permute.xlu2 %1016 }
0x1274   :  { %v2199_v13 = vmul.f32 %v1017_v37, %v1000_v31 }
0x1276   :  { %v1028_v38 = vpack.c.bf16 %v2199_v13, %v2199_v13 }
0x1278   :  { %1030 = vrot.lane.b32.xlu0 %v1028_v38, %s1907_s15 }
0x12ea   :  { %v1031_v39 = vpop.permute.xlu0 %1030 }
0x12eb   :  { %1688 = vmatmul.msk.bf16.vlgmr.msrb.gmra.mxu0 %vm168_vm0, %v1031_v39 }
0x12ec   :  { %1437 = vmatpush.bf16.msrb.mxu0 %v2165_v63 }
0x12f0   :  { %1438 = vmatpush.bf16.msrb.mxu0 %v2171_v0 }
0x1368   :  { %v1044_v45 = vpop.f32.mrf.mxu0 }
0x1369   :  { %v1048_v46 = vadd.f32 %v1044_v45, %v893_v43 }
0x136b   :  { %1811 = vtanh.f32 %v1048_v46  ;;  %v1689_v51 = vmul.f32 -1.442695, %v1048_v46 }
0x136d   :  { %1813 = vpow2.f32 %v1689_v51 }
0x1370   :  { %v1046_v47 = vpop.f32.mrf.mxu0 }
0x1371   :  { %v1812_v49 = vpop.eup %1811 }
0x1372   :  { %1071 = vrot.lane.b32.xlu1 %v1812_v49, %s1909_s28 }
0x1373   :  { %v1814_v52 = vpop.eup %1813 }
0x1374   :  { %v1052_v42 = vadd.f32 1.0, %v1814_v52 }
0x1376   :  { %1815 = vrcp.f32 %v1052_v42  ;;  %v1064_v57 = vand.u32 2147483648, %v1052_v42  ;;  %vm1058_vm7 = vweird.f32 %v1052_v42  ;;  %v1062_v58 = vand.u32 2147483647, %v1052_v42 }
0x1378   :  { %v1065_v60 = vor.u32 1.1754944e-38, %v1064_v57  ;;  %vm1063_vm9 = vcmp.eq.f32.partialorder %v1062_v58, 8.507059e+37 }
0x137a   :  { %422 = vrot.lane.b32.xlu1 %v2067_v44, %s1907_s15 }
0x137c   :  { %v1816_v3 = vpop.eup %1815 }
0x137d   :  { %v1054_v53 = vmul.f32 %v1816_v3, %v1052_v42  ;;  %vm1059_vm6 = vweird.f32 %v1816_v3 }
0x137e   :  { %vm1060_vm8 = vmor %vm1058_vm7, %vm1059_vm6 }
0x137f   :  { %v1055_v54 = vsub.f32 1.0, %v1054_v53 }
0x1381   :  { %v1056_v11 = vmul.f32 %v1816_v3, %v1055_v54 }
0x1383   :  { %v1057_v56 = vadd.f32 %v1816_v3, %v1056_v11 }
0x1385   :  { %v1061_v59 = vsel %vm1060_vm8, %v1816_v3, %v1057_v56 }
0x1386   :  { %v1066_v44 = vsel %vm1063_vm9, %v1065_v60, %v1061_v59 }
0x1387   :  { %v1069_v0 = vmul.f32 %v1066_v44, %v1013_v35 }
0x13e4   :  { %v1072_v61 = vpop.permute.xlu1 %1071 }
0x13e5   :  { %v1074_v62 = vmul.f32 %v1072_v61, %v1066_v44 }
0x13e7   :  { %1076 = vrot.lane.b32.xlu2 %v1074_v62, %s1909_s28 }
0x13ec   :  { %v423_v63 = vpop.permute.xlu1 %422 }
0x13ed   :  { %426 = vst.msk [vmem:[#allocation3 + $0x10] sm:$0xff] %vm168_vm0, %v423_v63 }
0x13ef   :  { %504 = vrot.lane.b32.xlu2 %v2087_v15, %s1907_s15 }
0x13f4   :  { %v839_v8 = vld [vmem:[#allocation3 + $0x10] sm:$0xff] }
0x1441   :  { %v1077_v1 = vpop.permute.xlu2 %1076 }
0x1442   :  { %v1079_v2 = vadd.f32 %v1077_v1, %v1069_v0 }
0x1444   :  { %1817 = vtanh.f32 %v1079_v2 }
0x1449   :  { %v505_v4 = vpop.permute.xlu2 %504 }
0x144a   :  { %v1818_v6 = vpop.eup %1817  ;;  %508 = vst.msk [vmem:[#allocation3 + $0x18] sm:$0xff] %vm168_vm0, %v505_v4 }
0x144b   :  { %1082 = vrot.lane.b32.xlu0 %v1818_v6, %s1909_s28 }
0x1451   :  { %v840_v9 = vld [vmem:[#allocation3 + $0x18] sm:$0xff] }
0x1452   :  { %v846_v10 = vpack.c.bf16 %v840_v9, %v839_v8 }
0x1454   :  { %1666 = vmatmul.msk.bf16.gmra.mxu1 %vm168_vm0, %v846_v10 }
0x14bd   :  { %v1083_v12 = vpop.permute.xlu0 %1082 }
0x14be   :  { %v2220_v14 = vmul.f32 %v1083_v12, %v1066_v44 }
0x14c0   :  { %v1094_v15 = vpack.c.bf16 %v2220_v14, %v2220_v14 }
0x14c2   :  { %1096 = vrot.lane.b32.xlu0 %v1094_v15, %s1907_s15 }
0x14d1   :  { %v895_v17 = vpop.f32.mrf.mxu1 }
0x14d2   :  { %v896_v18 = vadd.f32 %v2193_v7, %v895_v17 }
0x14d9   :  { %v897_v52 = vpop.f32.mrf.mxu1 }
0x14da   :  { %v898_v42 = vadd.f32 %v2193_v7, %v897_v52 }
0x1534   :  { %v1097_v16 = vpop.permute.xlu0 %1096 }
0x1535   :  { %1690 = vmatmul.msk.bf16.vlgmr.msra.gmra.mxu2 %vm168_vm0, %v1097_v16 }
0x15b8   :  { %v1110_v19 = vpop.f32.mrf.mxu2 }
0x15b9   :  { %v1114_v21 = vadd.f32 %v1110_v19, %v896_v18 }
0x15bb   :  { %1819 = vtanh.f32 %v1114_v21  ;;  %v1691_v24 = vmul.f32 -1.442695, %v1114_v21 }
0x15bd   :  { %1821 = vpow2.f32 %v1691_v24 }
0x15c0   :  { %v1112_v22 = vpop.f32.mrf.mxu2 }
0x15c1   :  { %v1820_v23 = vpop.eup %1819 }
0x15c2   :  { %1137 = vrot.lane.b32.xlu1 %v1820_v23, %s1909_s28 }
0x15c3   :  { %v1822_v25 = vpop.eup %1821 }
0x15c4   :  { %v1118_v26 = vadd.f32 1.0, %v1822_v25 }
0x15c6   :  { %1823 = vrcp.f32 %v1118_v26  ;;  %v1130_v32 = vand.u32 2147483648, %v1118_v26  ;;  %vm1124_vm11 = vweird.f32 %v1118_v26  ;;  %v1128_v33 = vand.u32 2147483647, %v1118_v26 }
0x15c8   :  { %v1131_v35 = vor.u32 1.1754944e-38, %v1130_v32  ;;  %vm1129_vm2 = vcmp.eq.f32.partialorder %v1128_v33, 8.507059e+37 }
0x15cc   :  { %v1824_v27 = vpop.eup %1823 }
0x15cd   :  { %v1120_v28 = vmul.f32 %v1824_v27, %v1118_v26  ;;  %vm1125_vm10 = vweird.f32 %v1824_v27 }
0x15ce   :  { %vm1126_vm12 = vmor %vm1124_vm11, %vm1125_vm10 }
0x15cf   :  { %v1121_v29 = vsub.f32 1.0, %v1120_v28 }
0x15d1   :  { %v1122_v30 = vmul.f32 %v1824_v27, %v1121_v29 }
0x15d3   :  { %v1123_v31 = vadd.f32 %v1824_v27, %v1122_v30 }
0x15d5   :  { %v1127_v34 = vsel %vm1126_vm12, %v1824_v27, %v1123_v31 }
0x15d6   :  { %v1132_v37 = vsel %vm1129_vm2, %v1131_v35, %v1127_v34 }
0x15d7   :  { %v1135_v39 = vmul.f32 %v1132_v37, %v1079_v2 }
0x1634   :  { %v1138_v36 = vpop.permute.xlu1 %1137 }
0x1635   :  { %v1140_v38 = vmul.f32 %v1138_v36, %v1132_v37 }
0x1637   :  { %1142 = vrot.lane.b32.xlu2 %v1140_v38, %s1909_s28 }
0x1691   :  { %v1143_v41 = vpop.permute.xlu2 %1142 }
0x1692   :  { %v1145_v43 = vadd.f32 %v1143_v41, %v1135_v39 }
0x1694   :  { %1825 = vtanh.f32 %v1145_v43 }
0x169a   :  { %v1826_v45 = vpop.eup %1825 }
0x169b   :  { %1148 = vrot.lane.b32.xlu0 %v1826_v45, %s1909_s28 }
0x170d   :  { %v1149_v46 = vpop.permute.xlu0 %1148 }
0x170e   :  { %v2230_v47 = vmul.f32 %v1149_v46, %v1132_v37 }
0x1710   :  { %v1160_v49 = vpack.c.bf16 %v2230_v47, %v2230_v47 }
0x1712   :  { %1162 = vrot.lane.b32.xlu1 %v1160_v49, %s1907_s15 }
0x1784   :  { %v1163_v51 = vpop.permute.xlu1 %1162 }
0x1785   :  { %1692 = vmatmul.msk.bf16.vlgmr.msra.gmra.mxu3 %vm168_vm0, %v1163_v51 }
0x1808   :  { %v1176_v3 = vpop.f32.mrf.mxu3 }
0x1809   :  { %v1180_v53 = vadd.f32 %v1176_v3, %v898_v42 }
0x180b   :  { %1827 = vtanh.f32 %v1180_v53  ;;  %v1693_v56 = vmul.f32 -1.442695, %v1180_v53 }
0x180d   :  { %1829 = vpow2.f32 %v1693_v56 }
0x1810   :  { %v1178_v54 = vpop.f32.mrf.mxu3 }
0x1811   :  { %v1828_v11 = vpop.eup %1827 }
0x1812   :  { %1203 = vrot.lane.b32.xlu2 %v1828_v11, %s1909_s28 }
0x1813   :  { %v1830_v57 = vpop.eup %1829 }
0x1814   :  { %v1184_v58 = vadd.f32 1.0, %v1830_v57 }
0x1816   :  { %1831 = vrcp.f32 %v1184_v58  ;;  %v1196_v63 = vand.u32 2147483648, %v1184_v58  ;;  %vm1190_vm14 = vweird.f32 %v1184_v58  ;;  %v1194_v0 = vand.u32 2147483647, %v1184_v58 }
0x1818   :  { %v1197_v2 = vor.u32 1.1754944e-38, %v1196_v63  ;;  %vm1195_vm1 = vcmp.eq.f32.partialorder %v1194_v0, 8.507059e+37 }
0x181a   :  { %586 = vrot.lane.b32.xlu2 %v2103_v48, %s1907_s15 }
0x181c   :  { %v1832_v59 = vpop.eup %1831 }
0x181d   :  { %v1186_v60 = vmul.f32 %v1832_v59, %v1184_v58  ;;  %vm1191_vm13 = vweird.f32 %v1832_v59 }
0x181e   :  { %vm1192_vm15 = vmor %vm1190_vm14, %vm1191_vm13 }
0x181f   :  { %v1187_v61 = vsub.f32 1.0, %v1186_v60 }
0x1821   :  { %v1188_v44 = vmul.f32 %v1832_v59, %v1187_v61 }
0x1823   :  { %v1189_v62 = vadd.f32 %v1832_v59, %v1188_v44 }
0x1825   :  { %v1193_v1 = vsel %vm1192_vm15, %v1832_v59, %v1189_v62 }
0x1826   :  { %v1198_v48 = vsel %vm1195_vm1, %v1197_v2, %v1193_v1 }
0x1827   :  { %v1201_v9 = vmul.f32 %v1198_v48, %v1145_v43  ;;  %v1879_v43 = vld [vmem:[%s2353_s5] ss:$0 sm:$0xff] }
0x1828   :  { %v142_v45 = vadd.f32 %v1879_v43, %v2207_v40 }
0x182a   :  { %v793_v49 = vadd.f32 %v2188_v5, %v142_v45 }
0x182c   :  { %v1656_v56 = vmul.f32 -1.442695, %v793_v49 }
0x186c   :  { %v1204_v4 = vpop.permute.xlu2 %1203 }
0x186d   :  { %v1206_v6 = vmul.f32 %v1204_v4, %v1198_v48 }
0x186f   :  { %1208 = vrot.lane.b32.xlu0 %v1206_v6, %s1909_s28 }
0x1874   :  { %v587_v8 = vpop.permute.xlu2 %586 }
0x1875   :  { %590 = vst.msk [vmem:[#allocation3 + $0x20] sm:$0xff] %vm168_vm0, %v587_v8 }
0x1877   :  { %668 = vrot.lane.b32.xlu0 %v2123_v20, %s1907_s15 }
0x187c   :  { %v841_v17 = vld [vmem:[#allocation3 + $0x20] sm:$0xff] }
0x18e1   :  { %v1209_v10 = vpop.permute.xlu0 %1208 }
0x18e2   :  { %v1211_v12 = vadd.f32 %v1209_v10, %v1201_v9 }
0x18e4   :  { %1833 = vtanh.f32 %v1211_v12 }
0x18e9   :  { %v669_v15 = vpop.permute.xlu0 %668 }
0x18ea   :  { %v1834_v16 = vpop.eup %1833  ;;  %672 = vst.msk [vmem:[#allocation3 + $0x28] sm:$0xff] %vm168_vm0, %v669_v15 }
0x18eb   :  { %1214 = vrot.lane.b32.xlu1 %v1834_v16, %s1909_s28 }
0x18f1   :  { %v842_v18 = vld [vmem:[#allocation3 + $0x28] sm:$0xff] }
0x18f2   :  { %v847_v19 = vpack.c.bf16 %v842_v18, %v841_v17 }
0x18f4   :  { %1667 = vmatmul.msk.bf16.gmra.mxu1 %vm168_vm0, %v847_v19 }
0x195d   :  { %v1215_v21 = vpop.permute.xlu1 %1214 }
0x195e   :  { %v2247_v22 = vmul.f32 %v1215_v21, %v1198_v48 }
0x1960   :  { %v1226_v20 = vpack.c.bf16 %v2247_v22, %v2247_v22 }
0x1962   :  { %1228 = vrot.lane.b32.xlu1 %v1226_v20, %s1907_s15 }
0x1971   :  { %v900_v24 = vpop.f32.mrf.mxu1 }
0x1972   :  { %v901_v25 = vadd.f32 %v2193_v7, %v900_v24 }
0x19d4   :  { %v1229_v23 = vpop.permute.xlu1 %1228 }
0x19d5   :  { %1694 = vmatmul.msk.bf16.vlgmr.msra.gmra.mxu0 %vm168_vm0, %v1229_v23 }
0x1a52   :  { %v1242_v26 = vpop.f32.mrf.mxu0 }
0x1a53   :  { %v1246_v27 = vadd.f32 %v1242_v26, %v901_v25 }
0x1a55   :  { %1835 = vtanh.f32 %v1246_v27  ;;  %v1695_v30 = vmul.f32 -1.442695, %v1246_v27 }
0x1a57   :  { %1837 = vpow2.f32 %v1695_v30 }
0x1a5a   :  { %v1244_v28 = vpop.f32.mrf.mxu0 }
0x1a5b   :  { %v1836_v29 = vpop.eup %1835 }
0x1a5c   :  { %1269 = vrot.lane.b32.xlu2 %v1836_v29, %s1909_s28 }
0x1a5d   :  { %v1838_v31 = vpop.eup %1837 }
0x1a5e   :  { %v1250_v32 = vadd.f32 1.0, %v1838_v31 }
0x1a60   :  { %1839 = vrcp.f32 %v1250_v32  ;;  %v1262_v38 = vand.u32 2147483648, %v1250_v32  ;;  %vm1256_vm4 = vweird.f32 %v1250_v32  ;;  %v1260_v39 = vand.u32 2147483647, %v1250_v32 }
0x1a61   :  { %1841 = vtanh.f32 %v793_v49 }
0x1a62   :  { %v1263_v46 = vor.u32 1.1754944e-38, %v1262_v38  ;;  %vm1261_vm6 = vcmp.eq.f32.partialorder %v1260_v39, 8.507059e+37 }
0x1a66   :  { %v1840_v33 = vpop.eup %1839 }
0x1a67   :  { %v1252_v34 = vmul.f32 %v1840_v33, %v1250_v32  ;;  %vm1257_vm3 = vweird.f32 %v1840_v33  ;;  %v1842_v3 = vpop.eup %1841 }
0x1a68   :  { %vm1258_vm5 = vmor %vm1256_vm4, %vm1257_vm3 }
0x1a69   :  { %v1253_v35 = vsub.f32 1.0, %v1252_v34 }
0x1a6b   :  { %v1254_v36 = vmul.f32 %v1840_v33, %v1253_v35 }
0x1a6d   :  { %v1255_v37 = vadd.f32 %v1840_v33, %v1254_v36 }
0x1a6f   :  { %v1259_v41 = vsel %vm1258_vm5, %v1840_v33, %v1255_v37 }
0x1a70   :  { %v1264_v52 = vsel %vm1261_vm6, %v1263_v46, %v1259_v41 }
0x1a71   :  { %v1267_v53 = vmul.f32 %v1264_v52, %v1211_v12  ;;  %v902_v12 = vpop.f32.mrf.mxu1 }
0x1a72   :  { %v903_v15 = vadd.f32 %v2193_v7, %v902_v12 }
0x1ab6   :  { %v1270_v51 = vpop.permute.xlu2 %1269 }
0x1ab7   :  { %v1272_v42 = vmul.f32 %v1270_v51, %v1264_v52 }
0x1ab9   :  { %1274 = vrot.lane.b32.xlu0 %v1272_v42, %s1909_s28 }
0x1ac1   :  { %816 = vrot.lane.b32.xlu0 %v1842_v3, %s1909_s28 }
0x1b2b   :  { %v1275_v54 = vpop.permute.xlu0 %1274 }
0x1b2c   :  { %v2262_v11 = vadd.f32 %v1275_v54, %v1267_v53 }
0x1b2e   :  { %1843 = vtanh.f32 %v2262_v11 }
0x1b2f   :  { %1845 = vpow2.f32 %v1656_v56 }
0x1b33   :  { %v817_v6 = vpop.permute.xlu0 %816 }
0x1b34   :  { %v1844_v40 = vpop.eup %1843 }
0x1b35   :  { %1280 = vrot.lane.b32.xlu1 %v1844_v40, %s1909_s28  ;;  %v1846_v5 = vpop.eup %1845 }
0x1b36   :  { %v797_v57 = vadd.f32 1.0, %v1846_v5 }
0x1b38   :  { %1847 = vrcp.f32 %v797_v57  ;;  %v809_v1 = vand.u32 2147483648, %v797_v57  ;;  %vm803_vm8 = vweird.f32 %v797_v57  ;;  %v807_v2 = vand.u32 2147483647, %v797_v57 }
0x1b3a   :  { %v810_v48 = vor.u32 1.1754944e-38, %v809_v1  ;;  %vm808_vm10 = vcmp.eq.f32.partialorder %v807_v2, 8.507059e+37 }
0x1b3e   :  { %v1848_v58 = vpop.eup %1847 }
0x1b3f   :  { %v799_v59 = vmul.f32 %v1848_v58, %v797_v57  ;;  %vm804_vm7 = vweird.f32 %v1848_v58 }
0x1b40   :  { %vm805_vm9 = vmor %vm803_vm8, %vm804_vm7 }
0x1b41   :  { %v800_v60 = vsub.f32 1.0, %v799_v59 }
0x1b43   :  { %v801_v61 = vmul.f32 %v1848_v58, %v800_v60 }
0x1b45   :  { %v802_v63 = vadd.f32 %v1848_v58, %v801_v61 }
0x1b47   :  { %v806_v4 = vsel %vm805_vm9, %v1848_v58, %v802_v63 }
0x1b48   :  { %v811_v8 = vsel %vm808_vm10, %v810_v48, %v806_v4 }
0x1b49   :  { %v819_v9 = vmul.f32 %v817_v6, %v811_v8  ;;  %v814_v19 = vmul.f32 %v811_v8, %v2136_v50 }
0x1ba7   :  { %v1281_v44 = vpop.permute.xlu1 %1280 }
0x1ba8   :  { %v2266_v62 = vmul.f32 %v1281_v44, %v1264_v52 }
0x1baa   :  { %v1292_v0 = vpack.c.bf16 %v2266_v62, %v2266_v62 }
0x1bac   :  { %1294 = vrot.lane.b32.xlu2 %v1292_v0, %s1907_s15 }
0x1bb4   :  { %821 = vrot.lane.b32.xlu2 %v819_v9, %s1909_s28 }
0x1c06   :  { %v1295_v10 = vpop.permute.xlu2 %1294 }
0x1c07   :  { %1696 = vmatmul.msk.bf16.vlgmr.msrb.gmra.mxu2 %vm168_vm0, %v1295_v10 }
0x1c0e   :  { %v822_v18 = vpop.permute.xlu2 %821 }
0x1c0f   :  { %v824_v21 = vadd.f32 %v822_v18, %v814_v19 }
0x1c8a   :  { %v1308_v16 = vpop.f32.mrf.mxu2 }
0x1c8b   :  { %v1312_v17 = vadd.f32 %v1308_v16, %v903_v15 }
0x1c8d   :  { %1849 = vtanh.f32 %v1312_v17  ;;  %v1697_v25 = vmul.f32 -1.442695, %v1312_v17 }
0x1c8e   :  { %1851 = vtanh.f32 %v824_v21 }
0x1c8f   :  { %1853 = vpow2.f32 %v1697_v25 }
0x1c92   :  { %v1310_v20 = vpop.f32.mrf.mxu2 }
0x1c93   :  { %v1850_v23 = vpop.eup %1849  ;;  %v1910_v20 = vmov 0  }
0x1c94   :  { %1335 = vrot.lane.b32.xlu1 %v1850_v23, %s1909_s28  ;;  %v1852_v24 = vpop.eup %1851  ;;  %1737 = vset.pattern.permute.xlu0 %v1910_v20 }
0x1c95   :  { %v1854_v26 = vpop.eup %1853  ;;  %1738 = vset.pattern.permute.xlu1 %v1910_v20  ;;  %1739 = vset.pattern.permute.xlu2 %v1910_v20 }
0x1c96   :  { %v1316_v27 = vadd.f32 1.0, %v1854_v26  ;;  %v64_v26 = vld [vmem:[%s2350_s2] sm:$0xff] }
0x1c97   :  { %vm1020_vm4 = vcmp.eq.s32.totalorder %v64_v26, 0  ;;  %vm1350_vm5 = vcmp.eq.s32.totalorder %v64_v26, 5  ;;  %vm1086_vm6 = vcmp.eq.s32.totalorder %v64_v26, 1  ;;  %vm1218_vm7 = vcmp.eq.s32.totalorder %v64_v26, 3 }
0x1c98   :  { %1855 = vrcp.f32 %v1316_v27  ;;  %v1328_v50 = vand.u32 2147483648, %v1316_v27  ;;  %vm1322_vm12 = vweird.f32 %v1316_v27  ;;  %v1326_v33 = vand.u32 2147483647, %v1316_v27 }
0x1c99   :  { %vm1416_vm8 = vcmp.eq.s32.totalorder %v64_v26, 6  ;;  %vm1482_vm9 = vcmp.eq.s32.totalorder %v64_v26, 7 }
0x1c9a   :  { %v1329_v35 = vor.u32 1.1754944e-38, %v1328_v50  ;;  %vm1327_vm13 = vcmp.eq.f32.partialorder %v1326_v33, 8.507059e+37 }
0x1c9c   :  { %827 = vrot.lane.b32.xlu1 %v1852_v24, %s1909_s28 }
0x1c9e   :  { %v1856_v28 = vpop.eup %1855 }
0x1c9f   :  { %v1318_v29 = vmul.f32 %v1856_v28, %v1316_v27  ;;  %vm1323_vm11 = vweird.f32 %v1856_v28  ;;  %v1021_v27 = vsel %vm1020_vm4, 1, %v1910_v20 }
0x1ca0   :  { %vm1324_vm2 = vmor %vm1322_vm12, %vm1323_vm11 }
0x1ca1   :  { %v1319_v30 = vsub.f32 1.0, %v1318_v29  ;;  %v1351_v29 = vsel %vm1350_vm5, 1, %v1910_v20 }
0x1ca3   :  { %v1320_v31 = vmul.f32 %v1856_v28, %v1319_v30 }
0x1ca5   :  { %v1321_v32 = vadd.f32 %v1856_v28, %v1320_v31 }
0x1ca7   :  { %v1325_v34 = vsel %vm1324_vm2, %v1856_v28, %v1321_v32 }
0x1ca8   :  { %v1330_v37 = vsel %vm1327_vm13, %v1329_v35, %v1325_v34  ;;  %v1087_v35 = vsel %vm1086_vm6, 1, %v1910_v20  ;;  %vm1152_vm13 = vcmp.eq.s32.totalorder %v64_v26, 2 }
0x1ca9   :  { %v1333_v43 = vmul.f32 %v1330_v37, %v2262_v11 }
0x1d06   :  { %v1336_v36 = vpop.permute.xlu1 %1335 }
0x1d07   :  { %v1338_v38 = vmul.f32 %v1336_v36, %v1330_v37  ;;  %v1219_v36 = vsel %vm1218_vm7, 1, %v1910_v20 }
0x1d09   :  { %1340 = vrot.lane.b32.xlu0 %v1338_v38, %s1909_s28 }
0x1d0e   :  { %v828_v39 = vpop.permute.xlu1 %827 }
0x1d0f   :  { %v830_v41 = vmul.f32 %v828_v39, %v811_v8 }
0x1d11   :  { %750 = vrot.lane.b32.xlu0 %v2155_v55, %s1907_s15  ;;  %832 = vrot.lane.b32.xlu1 %v830_v41, %s1907_s15 }
0x1d7b   :  { %v1341_v45 = vpop.permute.xlu0 %1340 }
0x1d7c   :  { %v1343_v46 = vadd.f32 %v1341_v45, %v1333_v43 }
0x1d7e   :  { %1857 = vtanh.f32 %v1343_v46 }
0x1d83   :  { %v751_v49 = vpop.permute.xlu0 %750  ;;  %v833_v51 = vpop.permute.xlu1 %832 }
0x1d84   :  { %v1858_v52 = vpop.eup %1857  ;;  %754 = vst.msk [vmem:[#allocation3 + $0x30] sm:$0xff] %vm168_vm0, %v751_v49 }
0x1d85   :  { %836 = vst.msk [vmem:[#allocation3 + $0x38] sm:$0xff] %vm168_vm0, %v833_v51  ;;  %1346 = vrot.lane.b32.xlu2 %v1858_v52, %s1909_s28 }
0x1d8b   :  { %v843_v42 = vld [vmem:[#allocation3 + $0x30] sm:$0xff] }
0x1d8c   :  { %v844_v3 = vld [vmem:[#allocation3 + $0x38] sm:$0xff] }
0x1d8d   :  { %v848_v53 = vpack.c.bf16 %v844_v3, %v843_v42 }
0x1d8f   :  { %1668 = vmatmul.msk.bf16.gmra.mxu1 %vm168_vm0, %v848_v53 }
0x1ddf   :  { %v1347_v55 = vpop.permute.xlu2 %1346 }
0x1de0   :  { %v2286_v54 = vmul.f32 %v1347_v55, %v1330_v37  ;;  %v1417_v37 = vsel %vm1416_vm8, 1, %v1910_v20 }
0x1de2   :  { %v1358_v11 = vpack.c.bf16 %v2286_v54, %v2286_v54 }
0x1de4   :  { %1360 = vrot.lane.b32.xlu2 %v1358_v11, %s1907_s15 }
0x1e0c   :  { %v905_v56 = vpop.f32.mrf.mxu1 }
0x1e0d   :  { %v906_v5 = vadd.f32 %v2193_v7, %v905_v56  ;;  %v1153_v56 = vsel %vm1152_vm13, 1, %v1910_v20 }
0x1e14   :  { %v907_v30 = vpop.f32.mrf.mxu1 }
0x1e15   :  { %v908_v31 = vadd.f32 %v2193_v7, %v907_v30 }
0x1e3e   :  { %v1361_v40 = vpop.permute.xlu2 %1360 }
0x1e3f   :  { %1698 = vmatmul.msk.bf16.vlgmr.msrb.gmra.mxu3 %vm168_vm0, %v1361_v40 }
0x1ec2   :  { %v1374_v57 = vpop.f32.mrf.mxu3 }
0x1ec3   :  { %v1378_v58 = vadd.f32 %v1374_v57, %v906_v5 }
0x1ec5   :  { %1859 = vtanh.f32 %v1378_v58  ;;  %v1699_v61 = vmul.f32 -1.442695, %v1378_v58 }
0x1ec7   :  { %1861 = vpow2.f32 %v1699_v61  ;;  %v1492_v61 = vld [vmem:[%s2359_s11 + $0x18] sm:$0xff] }
0x1ec8   :  { %1514 = vmatpush.msra.mxu2 %v1492_v61 }
0x1eca   :  { %v1376_v59 = vpop.f32.mrf.mxu3 }
0x1ecb   :  { %v1860_v60 = vpop.eup %1859 }
0x1ecc   :  { %1401 = vrot.lane.b32.xlu0 %v1860_v60, %s1909_s28 }
0x1ecd   :  { %v1862_v44 = vpop.eup %1861 }
0x1ece   :  { %v1382_v63 = vadd.f32 1.0, %v1862_v44  ;;  %v1491_v44 = vld [vmem:[%s2359_s11 + $0x10] sm:$0xff] }
0x1ecf   :  { %1515 = vmatpush.msra.mxu2 %v1491_v44 }
0x1ed0   :  { %1863 = vrcp.f32 %v1382_v63  ;;  %v1394_v6 = vand.u32 2147483648, %v1382_v63  ;;  %vm1388_vm15 = vweird.f32 %v1382_v63  ;;  %v1392_v8 = vand.u32 2147483647, %v1382_v63 }
0x1ed2   :  { %v1395_v10 = vor.u32 1.1754944e-38, %v1394_v6  ;;  %vm1393_vm3 = vcmp.eq.f32.partialorder %v1392_v8, 8.507059e+37 }
0x1ed6   :  { %v1864_v0 = vpop.eup %1863 }
0x1ed7   :  { %v1384_v1 = vmul.f32 %v1864_v0, %v1382_v63  ;;  %vm1389_vm14 = vweird.f32 %v1864_v0  ;;  %v1490_v63 = vld [vmem:[%s2359_s11 + $0x8] sm:$0xff] }
0x1ed8   :  { %vm1390_vm1 = vmor %vm1388_vm15, %vm1389_vm14  ;;  %vm1284_vm14 = vcmp.eq.s32.totalorder %v64_v26, 4  ;;  %1516 = vmatpush.msra.mxu2 %v1490_v63 }
0x1ed9   :  { %v1385_v2 = vsub.f32 1.0, %v1384_v1  ;;  %v1285_v5 = vsel %vm1284_vm14, 1, %v1910_v20 }
0x1edb   :  { %v1386_v4 = vmul.f32 %v1864_v0, %v1385_v2 }
0x1edd   :  { %v1387_v48 = vadd.f32 %v1864_v0, %v1386_v4 }
0x1edf   :  { %v1391_v9 = vsel %vm1390_vm1, %v1864_v0, %v1387_v48  ;;  %v1489_v0 = vld [vmem:[%s2359_s11] sm:$0xff] }
0x1ee0   :  { %v1396_v15 = vsel %vm1393_vm3, %v1395_v10, %v1391_v9  ;;  %1517 = vmatpush.msra.mxu2 %v1489_v0 }
0x1ee1   :  { %v1399_v17 = vmul.f32 %v1396_v15, %v1343_v46  ;;  %v1483_v46 = vsel %vm1482_vm9, 1, %v1910_v20 }
0x1f3e   :  { %v1402_v12 = vpop.permute.xlu0 %1401 }
0x1f3f   :  { %v1404_v16 = vmul.f32 %v1402_v12, %v1396_v15 }
0x1f41   :  { %1406 = vrot.lane.b32.xlu1 %v1404_v16, %s1909_s28 }
0x1fb3   :  { %v1407_v18 = vpop.permute.xlu1 %1406 }
0x1fb4   :  { %v2295_v19 = vadd.f32 %v1407_v18, %v1399_v17 }
0x1fb6   :  { %1865 = vtanh.f32 %v2295_v19 }
0x1fbc   :  { %v1866_v21 = vpop.eup %1865 }
0x1fbd   :  { %1412 = vrot.lane.b32.xlu2 %v1866_v21, %s1909_s28 }
0x2017   :  { %v1413_v23 = vpop.permute.xlu2 %1412 }
0x2018   :  { %v2302_v24 = vmul.f32 %v1413_v23, %v1396_v15 }
0x201a   :  { %v1424_v25 = vpack.c.bf16 %v2302_v24, %v2302_v24 }
0x201c   :  { %1426 = vrot.lane.b32.xlu0 %v1424_v25, %s1907_s15 }
0x2024   :  { %1023 = vperm.xlu0 %1737, %v1021_v27  }
0x202c   :  { %1353 = vperm.xlu0 %1737, %v1351_v29  }
0x2034   :  { %1485 = vperm.xlu0 %1737, %v1483_v46  }
0x208e   :  { %v1427_v28 = vpop.permute.xlu0 %1426 }
0x208f   :  { %1700 = vmatmul.msk.bf16.vlgmr.msrb.gmra.mxu0 %vm168_vm0, %v1427_v28 }
0x2096   :  { %v1024_v4 = vpop.permute.xlu0 %1023 }
0x2097   :  { %vm1025_vm15 = vcmp.eq.s32.totalorder %v1024_v4, 1 }
0x2098   :  { %v1026_v6 = vsel %vm1025_vm15, %v2199_v13, 0.0 }
0x209e   :  { %v1354_v10 = vpop.permute.xlu0 %1353 }
0x209f   :  { %vm1355_vm6 = vcmp.eq.s32.totalorder %v1354_v10, 1 }
0x210c   :  { %v1440_v32 = vpop.f32.mrf.mxu0 }
0x210d   :  { %v1444_v50 = vadd.f32 %v1440_v32, %v908_v31 }
0x210f   :  { %1867 = vtanh.f32 %v1444_v50  ;;  %v1701_v7 = vmul.f32 -1.442695, %v1444_v50 }
0x2111   :  { %1869 = vpow2.f32 %v1701_v7 }
0x2114   :  { %v1442_v33 = vpop.f32.mrf.mxu0 }
0x2115   :  { %v1868_v34 = vpop.eup %1867 }
0x2116   :  { %1467 = vrot.lane.b32.xlu1 %v1868_v34, %s1909_s28 }
0x2117   :  { %v1870_v38 = vpop.eup %1869 }
0x2118   :  { %v1448_v39 = vadd.f32 1.0, %v1870_v38 }
0x211a   :  { %1871 = vrcp.f32 %v1448_v39  ;;  %v1460_v52 = vand.u32 2147483648, %v1448_v39  ;;  %vm1454_vm11 = vweird.f32 %v1448_v39  ;;  %v1458_v42 = vand.u32 2147483647, %v1448_v39 }
0x211c   :  { %v1461_v53 = vor.u32 1.1754944e-38, %v1460_v52  ;;  %vm1459_vm2 = vcmp.eq.f32.partialorder %v1458_v42, 8.507059e+37 }
0x211e   :  { %1089 = vperm.xlu1 %1738, %v1087_v35  }
0x2120   :  { %v1872_v41 = vpop.eup %1871 }
0x2121   :  { %v1450_v43 = vmul.f32 %v1872_v41, %v1448_v39  ;;  %vm1455_vm10 = vweird.f32 %v1872_v41 }
0x2122   :  { %vm1456_vm12 = vmor %vm1454_vm11, %vm1455_vm10 }
0x2123   :  { %v1451_v45 = vsub.f32 1.0, %v1450_v43 }
0x2125   :  { %v1452_v49 = vmul.f32 %v1872_v41, %v1451_v45 }
0x2126   :  { %1221 = vperm.xlu1 %1738, %v1219_v36  }
0x2127   :  { %v1453_v51 = vadd.f32 %v1872_v41, %v1452_v49 }
0x2129   :  { %v1457_v3 = vsel %vm1456_vm12, %v1872_v41, %v1453_v51 }
0x212a   :  { %v1462_v11 = vsel %vm1459_vm2, %v1461_v53, %v1457_v3 }
0x212b   :  { %v1465_v57 = vmul.f32 %v1462_v11, %v2295_v19  ;;  %v1486_v19 = vpop.permute.xlu0 %1485 }
0x212c   :  { %vm1487_vm8 = vcmp.eq.s32.totalorder %v1486_v19, 1 }
0x212e   :  { %1419 = vperm.xlu1 %1738, %v1417_v37  }
0x2188   :  { %v1468_v55 = vpop.permute.xlu1 %1467 }
0x2189   :  { %v1470_v40 = vmul.f32 %v1468_v55, %v1462_v11 }
0x218b   :  { %1472 = vrot.lane.b32.xlu2 %v1470_v40, %s1909_s28 }
0x2190   :  { %v1090_v1 = vpop.permute.xlu1 %1089 }
0x2191   :  { %vm1091_vm1 = vcmp.eq.s32.totalorder %v1090_v1, 1 }
0x2192   :  { %v1092_v9 = vsel %vm1091_vm1, %v2220_v14, %v1026_v6 }
0x2193   :  { %1155 = vperm.xlu2 %1739, %v1153_v56  }
0x2198   :  { %v1222_v48 = vpop.permute.xlu1 %1221 }
0x2199   :  { %vm1223_vm4 = vcmp.eq.s32.totalorder %v1222_v48, 1 }
0x219b   :  { %1287 = vperm.xlu2 %1739, %v1285_v5  }
0x21a0   :  { %v1420_v17 = vpop.permute.xlu1 %1419 }
0x21a1   :  { %vm1421_vm7 = vcmp.eq.s32.totalorder %v1420_v17, 1 }
0x21e5   :  { %v1473_v58 = vpop.permute.xlu2 %1472 }
0x21e6   :  { %v1475_v59 = vadd.f32 %v1473_v58, %v1465_v57 }
0x21e8   :  { %1873 = vtanh.f32 %v1475_v59 }
0x21ed   :  { %v1156_v2 = vpop.permute.xlu2 %1155 }
0x21ee   :  { %v1874_v60 = vpop.eup %1873  ;;  %vm1157_vm3 = vcmp.eq.s32.totalorder %v1156_v2, 1 }
0x21ef   :  { %1478 = vrot.lane.b32.xlu2 %v1874_v60, %s1909_s28  ;;  %v1158_v12 = vsel %vm1157_vm3, %v2230_v47, %v1092_v9 }
0x21f0   :  { %v1224_v15 = vsel %vm1223_vm4, %v2247_v22, %v1158_v12  ;;  %v1742_v22 = vld [vmem:[#allocation4] ss:$0 sm:$0xff] }
0x21f5   :  { %v1288_v8 = vpop.permute.xlu2 %1287 }
0x21f6   :  { %vm1289_vm5 = vcmp.eq.s32.totalorder %v1288_v8, 1 }
0x21f7   :  { %v1290_v16 = vsel %vm1289_vm5, %v2266_v62, %v1224_v15 }
0x21f8   :  { %v1356_v18 = vsel %vm1355_vm6, %v2286_v54, %v1290_v16 }
0x21f9   :  { %v1422_v14 = vsel %vm1421_vm7, %v2302_v24, %v1356_v18 }
0x2249   :  { %v1479_v21 = vpop.permute.xlu2 %1478 }
0x224a   :  { %v1481_v13 = vmul.f32 %v1479_v21, %v1462_v11 }
0x224c   :  { %v1488_v20 = vsel %vm1487_vm8, %v1481_v13, %v1422_v14 }
0x224d   :  { %1498 = vrot.lane.b32.xlu1 %v1488_v20, %s1907_s15 }
0x22bf   :  { %v1499_v47 = vpop.permute.xlu1 %1498 }
0x22c0   :  { %1702 = vmatmul.msk.f32.vlgmr.msra.gmra.mxu2 %vm168_vm0, %v1499_v47  ;;  %vm1541_vm0 = vcmask 7168  }
0x2343   :  { %v1519_v23 = vpop.f32.mrf.mxu2 }
0x2344   :  { %v1520_v62 = vadd.f32 %v1742_v22, %v1519_v23 }
0x2346   :  { %v1703_v25 = vmul.f32 -1.442695, %v1520_v62 }
0x2348   :  { %1875 = vpow2.f32 %v1703_v25 }
0x234e   :  { %v1876_v26 = vpop.eup %1875 }
0x234f   :  { %v1525_v54 = vadd.f32 1.0, %v1876_v26 }
0x2351   :  { %1877 = vrcp.f32 %v1525_v54  ;;  %v1537_v30 = vand.u32 2147483648, %v1525_v54  ;;  %v1535_v24 = vand.u32 2147483647, %v1525_v54  ;;  %vm1531_vm10 = vweird.f32 %v1525_v54 }
0x2353   :  { %v1538_v50 = vor.u32 1.1754944e-38, %v1537_v30  ;;  %vm1536_vm12 = vcmp.eq.f32.partialorder %v1535_v24, 8.507059e+37 }
0x2357   :  { %v1878_v27 = vpop.eup %1877 }
0x2358   :  { %v1527_v28 = vmul.f32 %v1878_v27, %v1525_v54  ;;  %vm1532_vm9 = vweird.f32 %v1878_v27 }
0x2359   :  { %vm1533_vm11 = vmor %vm1531_vm10, %vm1532_vm9 }
0x235a   :  { %v1528_v29 = vsub.f32 1.0, %v1527_v28 }
0x235c   :  { %v1529_v31 = vmul.f32 %v1878_v27, %v1528_v29 }
0x235e   :  { %v1530_v32 = vadd.f32 %v1878_v27, %v1529_v31 }
0x2360   :  { %v1534_v33 = vsel %vm1533_vm11, %v1878_v27, %v1530_v32 }
0x2361   :  { %v1539_v34 = vsel %vm1536_vm12, %v1538_v50, %v1534_v33 }
0x2362   :  { %1542 = vst.msk [vmem:[%s2361_s13] sm:$0xff] %vm1541_vm0, %v1539_v34 }
0x2363   :  { %1547 = vsyncpa [#allocation6], 1 }

</bundles_post_ra>
